<compile_context>
chip_gen: v7x
topology: tpu7x:2x2x1
jax: 0.10.0
libtpu: 0.0.40
codegen_flags: <defaults>
</compile_context>

<pallas_src>
import jax
import jax.numpy as jnp
from jax.experimental import pallas as pl
from jax.experimental.pallas import tpu as pltpu


# ----------------------------------------------------------------------------
# Fused Pallas kernel: num_layers x LSTM  +  attention pooling
# ----------------------------------------------------------------------------
def make_fused_kernel(T, b_tile, H, num_layers, matmul_dtype):
    mdt = matmul_dtype

    def kernel(*refs):
        x_ref = refs[0]                                    # [T, Bt, E] time-major
        layer_refs = refs[1:1 + 5 * num_layers]
        (w1_ref, b1_ref, w2_ref, b2_ref,                   # attention weights
         out_ref,                                          # [Bt, H] output
         seq_a_ref, seq_b_ref, gx_ref) = refs[1 + 5 * num_layers:]
        seq_bufs = (seq_a_ref, seq_b_ref)

        cur_in = x_ref[...].astype(jnp.float32)            # layer-0 input

        for layer in range(num_layers):
            (w_ih_ref, w_hh_ref, b_ref,
             h0_ref, c0_ref) = layer_refs[5 * layer: 5 * layer + 5]
            out_buf = seq_bufs[layer % 2]

            # ---- hoisted input projection: one MXU contraction for all steps,
            #      single bias broadcast, result resident in VMEM scratch.
            gx_ref[...] = (
                jnp.einsum('tbe,ef->tbf',
                           cur_in.astype(mdt),
                           w_ih_ref[...].astype(mdt),
                           preferred_element_type=jnp.float32)
                + b_ref[...])                              # [T, Bt, 4H] f32

            w_hh = w_hh_ref[...].astype(mdt)               # hoisted cast

            # ---- recurrence: per step only h @ W_hh + precomputed gates.
            def step(t, carry):
                h, c = carry                               # f32 state
                gates = gx_ref[t] + jnp.dot(
                    h.astype(mdt), w_hh,
                    preferred_element_type=jnp.float32)    # [Bt, 4H]
                i = jax.nn.sigmoid(gates[:, 0 * H:1 * H])
                f = jax.nn.sigmoid(gates[:, 1 * H:2 * H])
                g = jnp.tanh(gates[:, 2 * H:3 * H])
                o = jax.nn.sigmoid(gates[:, 3 * H:4 * H])
                c_new = f * c + i * g
                h_new = o * jnp.tanh(c_new)
                out_buf[t] = h_new
                return (h_new, c_new)

            # Fully unrolled (T is small & static) so MXU push / EUP / stores
            # of consecutive steps can interleave.
            jax.lax.fori_loop(0, T, step,
                              (h0_ref[...], c0_ref[...]), unroll=True)

            cur_in = out_buf[...]                          # [T, Bt, H]

        outs = cur_in                                      # final LSTM outputs

        # ---- attention scores: flat contractions (no dot batch dims).
        s1 = jnp.tanh(
            jnp.einsum('tbh,hd->tbd', outs.astype(mdt), w1_ref[...].astype(mdt),
                       preferred_element_type=jnp.float32) + b1_ref[...])
        s2 = jnp.einsum('tbd,dr->tbr', s1.astype(mdt), w2_ref[...].astype(mdt),
                        preferred_element_type=jnp.float32) + b2_ref[...]

        # ---- stable softmax over the time axis (axis 0 in time-major layout).
        m = jnp.max(s2, axis=0, keepdims=True)
        e = jnp.exp(s2 - m)
        denom = jnp.sum(e, axis=0, keepdims=True)
        att = e * pl.reciprocal(denom, approx=True)        # [T, Bt, r]

        # ---- collapsed hop average (exact):
        #      sum_r(att^T @ outs) / r == (mean_r att)^T @ outs
        att_mean = jnp.mean(att, axis=2, keepdims=True)    # [T, Bt, 1]
        out_ref[...] = jnp.sum(att_mean * outs, axis=0)    # [Bt, H]

    return kernel


# ----------------------------------------------------------------------------
# Wrapper
# ----------------------------------------------------------------------------
def _pick_batch_tile(B):
    # Batch sits in the sublane (second-to-last) slot of the [T, B, *] blocks,
    # so a partial tile must be a multiple of 8; otherwise take the full batch.
    for cand in (256, 128, 64, 32, 16, 8):
        if B % cand == 0:
            return cand
    return B


def fused_forward(x_tm, layer_params, w1, b1, w2, b2, *,
                  matmul_dtype=jnp.float32):
    T, B, E = x_tm.shape
    H = layer_params[0]['h0'].shape[-1]
    num_layers = len(layer_params)
    d_a = w1.shape[1]
    r = w2.shape[1]

    b_tile = _pick_batch_tile(B)
    grid = (B // b_tile,)

    kernel = make_fused_kernel(T, b_tile, H, num_layers, matmul_dtype)

    in_specs = [pl.BlockSpec((T, b_tile, E), lambda b: (0, b, 0))]   # activations
    flat_args = [x_tm]
    for lp in layer_params:
        in_dim = lp['w_ih'].shape[0]
        in_specs += [
            pl.BlockSpec((in_dim, 4 * H), lambda b: (0, 0)),   # w_ih  (shared)
            pl.BlockSpec((H, 4 * H), lambda b: (0, 0)),        # w_hh  (shared)
            pl.BlockSpec((1, 4 * H), lambda b: (0, 0)),        # bias  (shared)
            pl.BlockSpec((b_tile, H), lambda b: (b, 0)),       # h0 (batch tile)
            pl.BlockSpec((b_tile, H), lambda b: (b, 0)),       # c0 (batch tile)
        ]
        flat_args += [lp['w_ih'], lp['w_hh'], lp['b'], lp['h0'], lp['c0']]
    in_specs += [
        pl.BlockSpec((H, d_a), lambda b: (0, 0)),              # linear_first.W^T
        pl.BlockSpec((1, d_a), lambda b: (0, 0)),              # linear_first.b
        pl.BlockSpec((d_a, r), lambda b: (0, 0)),              # linear_second.W^T
        pl.BlockSpec((1, r), lambda b: (0, 0)),                # linear_second.b
    ]
    flat_args += [w1, b1, w2, b2]

    return pl.pallas_call(
        kernel,
        grid=grid,
        in_specs=in_specs,
        out_specs=pl.BlockSpec((b_tile, H), lambda b: (b, 0)),
        out_shape=jax.ShapeDtypeStruct((B, H), jnp.float32),
        scratch_shapes=[
            pltpu.VMEM((T, b_tile, H), jnp.float32),       # layer output (ping)
            pltpu.VMEM((T, b_tile, H), jnp.float32),       # layer output (pong)
            pltpu.VMEM((T, b_tile, 4 * H), jnp.float32),   # hoisted gate preacts
        ],
        compiler_params=pltpu.CompilerParams(
            dimension_semantics=("parallel",),             # batch across TCs (v7x)
            vmem_limit_bytes=32 * 1024 * 1024,             # > v5e's 16 MiB default
        ),
    )(*flat_args)


def structured_self_attention_forward(token_ids, params, *,
                                      matmul_dtype=jnp.float32):
    """Full eval-mode forward.  Returns avg_sentence_embeddings [B, H]."""
    # Gather embeddings directly time-major: no [B, T, E] HBM transpose.
    emb_tm = jnp.take(params['embedding'], token_ids.T, axis=0
                      ).astype(jnp.float32)                # [T, B, E]
    layer_params = [
        dict(w_ih=params['w_ih'][l], w_hh=params['w_hh'][l], b=params['b'][l],
             h0=params['h0'][l], c0=params['c0'][l])
        for l in range(len(params['w_ih']))
    ]
    return fused_forward(emb_tm, layer_params,
                         params['w1'], params['b1'],
                         params['w2'], params['b2'],
                         matmul_dtype=matmul_dtype)


# ----------------------------------------------------------------------------
# Pure-JAX reference (correctness check only)
# ----------------------------------------------------------------------------
def reference_forward(token_ids, params):
    emb = jnp.take(params['embedding'], token_ids, axis=0).astype(jnp.float32)
    x = emb                                                # [B, T, E]
    for layer in range(len(params['w_ih'])):
        w_ih, w_hh, b = params['w_ih'][layer], params['w_hh'][layer], params['b'][layer]
        h0, c0 = params['h0'][layer], params['c0'][layer]
        H = h0.shape[1]

        def step(carry, x_t):
            h, c = carry
            gates = x_t @ w_ih + h @ w_hh + b
            i = jax.nn.sigmoid(gates[:, 0 * H:1 * H])
            f = jax.nn.sigmoid(gates[:, 1 * H:2 * H])
            g = jnp.tanh(gates[:, 2 * H:3 * H])
            o = jax.nn.sigmoid(gates[:, 3 * H:4 * H])
            c_new = f * c + i * g
            h_new = o * jnp.tanh(c_new)
            return (h_new, c_new), h_new

        _, hs = jax.lax.scan(step, (h0, c0), jnp.transpose(x, (1, 0, 2)))
        x = jnp.transpose(hs, (1, 0, 2))                   # [B, T, H]
    outputs = x
    s1 = jnp.tanh(jnp.einsum('bth,hd->btd', outputs, params['w1']) + params['b1'])
    s2 = jnp.einsum('btd,dr->btr', s1, params['w2']) + params['b2']
    att = jax.nn.softmax(s2, axis=1)
    sent = jnp.einsum('btr,bth->brh', att, outputs)
    return jnp.sum(sent, axis=1) / att.shape[2]


# ----------------------------------------------------------------------------
# Deterministic parameter construction
# ----------------------------------------------------------------------------
def make_params(key, *, vocab_size, emb_dim, lstm_hid_dim, d_a, r,
                num_layers, batch_size):
    keys = iter(jax.random.split(key, 64))
    H = lstm_hid_dim

    def nrm(shape, scale=0.1):
        return scale * jax.random.normal(next(keys), shape, dtype=jnp.float32)

    params = {
        'embedding': nrm((vocab_size, emb_dim), 1.0),
        'w_ih': [], 'w_hh': [], 'b': [], 'h0': [], 'c0': [],
        'w1': nrm((H, d_a)),            # linear_first.weight^T
        'b1': nrm((1, d_a)),            # linear_first.bias
        'w2': nrm((d_a, r)),            # linear_second.weight^T
        'b2': nrm((1, r)),              # linear_second.bias
        # linear_final is defined by the module but unused in forward()
    }
    for _layer in range(num_layers):
        in_dim = emb_dim if _layer == 0 else H
        params['w_ih'].append(nrm((in_dim, 4 * H)))
        params['w_hh'].append(nrm((H, 4 * H)))
        b_ih = nrm((1, 4 * H))
        b_hh = nrm((1, 4 * H))
        params['b'].append(b_ih + b_hh)
        # init_hidden uses torch.randn; deterministic equivalent here:
        params['h0'].append(jax.random.normal(next(keys), (batch_size, H),
                                              dtype=jnp.float32))
        params['c0'].append(jax.random.normal(next(keys), (batch_size, H),
                                              dtype=jnp.float32))
    return params


# ----------------------------------------------------------------------------
if __name__ == "__main__":
    # Small, self-consistent config
    B = 2            # batch
    T = 8            # max_len (sequence length)
    EMB = 32         # emb_dim
    H = 32           # lstm_hid_dim
    D_A = 16         # d_a
    R = 4            # attention hops
    VOCAB = 50
    NUM_LAYERS = 2

    key = jax.random.PRNGKey(0)
    k_ids, k_par = jax.random.split(key)

    token_ids = jax.random.randint(k_ids, (B, T), 0, VOCAB, dtype=jnp.int32)
    params = make_params(k_par, vocab_size=VOCAB, emb_dim=EMB,
                         lstm_hid_dim=H, d_a=D_A, r=R,
                         num_layers=NUM_LAYERS, batch_size=B)

    ref = jax.block_until_ready(reference_forward(token_ids, params))

    # f32 matmul path (tolerance accounts for the approximate EUP reciprocal).
    out_f32 = jax.block_until_ready(
        structured_self_attention_forward(token_ids, params,
                                          matmul_dtype=jnp.float32))
    assert out_f32.shape == (B, H), f"bad output shape {out_f32.shape}"
    assert jnp.allclose(out_f32, ref, rtol=1e-2, atol=1e-2), "f32 mismatch vs reference"

    # bf16 matmul operands / f32 accumulation & state (v6e/v7x MXU fast path).
    out_bf16 = jax.block_until_ready(
        structured_self_attention_forward(token_ids, params,
                                          matmul_dtype=jnp.bfloat16))
    assert out_bf16.shape == (B, H)
    assert jnp.allclose(out_bf16, ref, rtol=7e-2, atol=7e-2), "bf16 mismatch vs reference"

    print("KERNEL_OK")
</pallas_src>

<mosaic_0001>
module attributes {stable_mosaic.version = 11 : i64} {
  func.func @kernel(%arg0: i32, %arg1: memref<8x2x32xf32, #tpu.memory_space<vmem>>, %arg2: memref<32x128xf32, #tpu.memory_space<vmem>>, %arg3: memref<32x128xf32, #tpu.memory_space<vmem>>, %arg4: memref<1x128xf32, #tpu.memory_space<vmem>>, %arg5: memref<2x32xf32, #tpu.memory_space<vmem>>, %arg6: memref<2x32xf32, #tpu.memory_space<vmem>>, %arg7: memref<32x128xf32, #tpu.memory_space<vmem>>, %arg8: memref<32x128xf32, #tpu.memory_space<vmem>>, %arg9: memref<1x128xf32, #tpu.memory_space<vmem>>, %arg10: memref<2x32xf32, #tpu.memory_space<vmem>>, %arg11: memref<2x32xf32, #tpu.memory_space<vmem>>, %arg12: memref<32x16xf32, #tpu.memory_space<vmem>>, %arg13: memref<1x16xf32, #tpu.memory_space<vmem>>, %arg14: memref<16x4xf32, #tpu.memory_space<vmem>>, %arg15: memref<1x4xf32, #tpu.memory_space<vmem>>, %arg16: memref<2x32xf32, #tpu.memory_space<vmem>>, %arg17: memref<8x2x32xf32, #tpu.memory_space<vmem>>, %arg18: memref<8x2x32xf32, #tpu.memory_space<vmem>>, %arg19: memref<8x2x128xf32, #tpu.memory_space<vmem>>) attributes {dimension_semantics = [#tpu.dimension_semantics<parallel>], iteration_bounds = array<i64: 1>, scalar_prefetch = 0 : i64, scratch_operands = 3 : i64, tpu.core_type = #tpu.core_type<tc>, window_params = [{transform_indices = @transform_0, window_bounds = array<i64: 8, 2, 32>}, {pipeline_mode = #tpu.pipeline_mode<synchronous>, transform_indices = @transform_1, window_bounds = array<i64: 32, 128>}, {pipeline_mode = #tpu.pipeline_mode<synchronous>, transform_indices = @transform_2, window_bounds = array<i64: 32, 128>}, {pipeline_mode = #tpu.pipeline_mode<synchronous>, transform_indices = @transform_3, window_bounds = array<i64: 1, 128>}, {transform_indices = @transform_4, window_bounds = array<i64: 2, 32>}, {transform_indices = @transform_5, window_bounds = array<i64: 2, 32>}, {pipeline_mode = #tpu.pipeline_mode<synchronous>, transform_indices = @transform_6, window_bounds = array<i64: 32, 128>}, {pipeline_mode = #tpu.pipeline_mode<synchronous>, transform_indices = @transform_7, window_bounds = array<i64: 32, 128>}, {pipeline_mode = #tpu.pipeline_mode<synchronous>, transform_indices = @transform_8, window_bounds = array<i64: 1, 128>}, {transform_indices = @transform_9, window_bounds = array<i64: 2, 32>}, {transform_indices = @transform_10, window_bounds = array<i64: 2, 32>}, {pipeline_mode = #tpu.pipeline_mode<synchronous>, transform_indices = @transform_11, window_bounds = array<i64: 32, 16>}, {pipeline_mode = #tpu.pipeline_mode<synchronous>, transform_indices = @transform_12, window_bounds = array<i64: 1, 16>}, {pipeline_mode = #tpu.pipeline_mode<synchronous>, transform_indices = @transform_13, window_bounds = array<i64: 16, 4>}, {pipeline_mode = #tpu.pipeline_mode<synchronous>, transform_indices = @transform_14, window_bounds = array<i64: 1, 4>}, {transform_indices = @transform_15, window_bounds = array<i64: 2, 32>}]} {
    %c0 = arith.constant 0 : index
    %c0_0 = arith.constant 0 : index
    %c0_1 = arith.constant 0 : index
    %0 = vector.load %arg1[%c0, %c0_0, %c0_1] : memref<8x2x32xf32, #tpu.memory_space<vmem>>, vector<8x2x32xf32>
    %c0_2 = arith.constant 0 : index
    %c0_3 = arith.constant 0 : index
    %1 = vector.load %arg2[%c0_2, %c0_3] : memref<32x128xf32, #tpu.memory_space<vmem>>, vector<32x128xf32>
    "tpu.trace_start"() <{level = 10 : i32, message = "tbe,ef->tbf"}> : () -> ()
    %cst = arith.constant dense<0.000000e+00> : vector<8x2x128xf32>
    %2 = tpu.matmul %0, %1, %cst {dimension_numbers = #tpu.dot_dimension_numbers<[2], [0], [0, 1], [1], [0, 0, 0, 1, 1, 1], [], []>} : vector<8x2x32xf32>, vector<32x128xf32>, vector<8x2x128xf32> -> vector<8x2x128xf32>
    "tpu.trace_stop"() : () -> ()
    %c0_4 = arith.constant 0 : index
    %c0_5 = arith.constant 0 : index
    %3 = vector.load %arg4[%c0_4, %c0_5] : memref<1x128xf32, #tpu.memory_space<vmem>>, vector<1x128xf32>
    %4 = vector.shape_cast %3 : vector<1x128xf32> to vector<1x1x128xf32>
    %5 = vector.broadcast %4 : vector<1x1x128xf32> to vector<8x2x128xf32>
    %6 = arith.addf %2, %5 : vector<8x2x128xf32>
    %c0_6 = arith.constant 0 : index
    %c0_7 = arith.constant 0 : index
    %c0_8 = arith.constant 0 : index
    %7 = vector.load %arg19[%c0_6, %c0_7, %c0_8] : memref<8x2x128xf32, #tpu.memory_space<vmem>>, vector<8x2x128xf32>
    tpu.vector_store %arg19[%c0_6, %c0_7, %c0_8], %6 {strides = array<i32>} : memref<8x2x128xf32, #tpu.memory_space<vmem>>, vector<8x2x128xf32>,
    %c0_9 = arith.constant 0 : index
    %c0_10 = arith.constant 0 : index
    %8 = vector.load %arg3[%c0_9, %c0_10] : memref<32x128xf32, #tpu.memory_space<vmem>>, vector<32x128xf32>
    %c0_11 = arith.constant 0 : index
    %c0_12 = arith.constant 0 : index
    %9 = vector.load %arg5[%c0_11, %c0_12] : memref<2x32xf32, #tpu.memory_space<vmem>>, vector<2x32xf32>
    %c0_13 = arith.constant 0 : index
    %c0_14 = arith.constant 0 : index
    %10 = vector.load %arg6[%c0_13, %c0_14] : memref<2x32xf32, #tpu.memory_space<vmem>>, vector<2x32xf32>
    %c0_i32 = arith.constant 0 : i32
    %11 = arith.index_cast %c0_i32 : i32 to index
    %c0_15 = arith.constant 0 : index
    %c0_16 = arith.constant 0 : index
    %12 = vector.load %arg19[%11, %c0_15, %c0_16] : memref<8x2x128xf32, #tpu.memory_space<vmem>>, vector<1x2x128xf32>
    %13 = vector.shape_cast %12 : vector<1x2x128xf32> to vector<2x128xf32>
    %cst_17 = arith.constant dense<0.000000e+00> : vector<2x128xf32>
    %14 = tpu.matmul %9, %8, %cst_17 {dimension_numbers = #tpu.dot_dimension_numbers<[1], [0], [0], [1], [0, 0, 1, 1], [], []>} : vector<2x32xf32>, vector<32x128xf32>, vector<2x128xf32> -> vector<2x128xf32>
    %15 = arith.addf %13, %14 : vector<2x128xf32>
    %16 = vector.extract_strided_slice %15 {offsets = [0, 0], sizes = [2, 32], strides = [1, 1]} : vector<2x128xf32> to vector<2x32xf32>
    %17 = arith.negf %16 : vector<2x32xf32>
    %18 = math.exp %17 : vector<2x32xf32>
    %cst_18 = arith.constant 1.000000e+00 : f32
    %19 = vector.broadcast %cst_18 : f32 to vector<2x32xf32>
    %20 = arith.addf %19, %18 : vector<2x32xf32>
    %21 = arith.divf %19, %20 : vector<2x32xf32>
    %22 = vector.extract_strided_slice %15 {offsets = [0, 32], sizes = [2, 32], strides = [1, 1]} : vector<2x128xf32> to vector<2x32xf32>
    %23 = arith.negf %22 : vector<2x32xf32>
    %24 = math.exp %23 : vector<2x32xf32>
    %cst_19 = arith.constant 1.000000e+00 : f32
    %25 = vector.broadcast %cst_19 : f32 to vector<2x32xf32>
    %26 = arith.addf %25, %24 : vector<2x32xf32>
    %27 = arith.divf %25, %26 : vector<2x32xf32>
    %28 = vector.extract_strided_slice %15 {offsets = [0, 64], sizes = [2, 32], strides = [1, 1]} : vector<2x128xf32> to vector<2x32xf32>
    %29 = math.tanh %28 : vector<2x32xf32>
    %30 = vector.extract_strided_slice %15 {offsets = [0, 96], sizes = [2, 32], strides = [1, 1]} : vector<2x128xf32> to vector<2x32xf32>
    %31 = arith.negf %30 : vector<2x32xf32>
    %32 = math.exp %31 : vector<2x32xf32>
    %cst_20 = arith.constant 1.000000e+00 : f32
    %33 = vector.broadcast %cst_20 : f32 to vector<2x32xf32>
    %34 = arith.addf %33, %32 : vector<2x32xf32>
    %35 = arith.divf %33, %34 : vector<2x32xf32>
    %36 = arith.mulf %27, %10 : vector<2x32xf32>
    %37 = arith.mulf %21, %29 : vector<2x32xf32>
    %38 = arith.addf %36, %37 : vector<2x32xf32>
    %39 = math.tanh %38 : vector<2x32xf32>
    %40 = arith.mulf %35, %39 : vector<2x32xf32>
    %41 = arith.index_cast %c0_i32 : i32 to index
    %c0_21 = arith.constant 0 : index
    %c0_22 = arith.constant 0 : index
    %42 = vector.load %arg17[%41, %c0_21, %c0_22] : memref<8x2x32xf32, #tpu.memory_space<vmem>>, vector<1x2x32xf32>
    %43 = vector.shape_cast %42 : vector<1x2x32xf32> to vector<2x32xf32>
    %44 = vector.shape_cast %40 : vector<2x32xf32> to vector<1x2x32xf32>
    tpu.vector_store %arg17[%41, %c0_21, %c0_22], %44 {strides = array<i32>} : memref<8x2x32xf32, #tpu.memory_space<vmem>>, vector<1x2x32xf32>,
    %c1_i32 = arith.constant 1 : i32
    %45 = arith.index_cast %c1_i32 : i32 to index
    %c0_23 = arith.constant 0 : index
    %c0_24 = arith.constant 0 : index
    %46 = vector.load %arg19[%45, %c0_23, %c0_24] : memref<8x2x128xf32, #tpu.memory_space<vmem>>, vector<1x2x128xf32>
    %47 = vector.shape_cast %46 : vector<1x2x128xf32> to vector<2x128xf32>
    %cst_25 = arith.constant dense<0.000000e+00> : vector<2x128xf32>
    %48 = tpu.matmul %40, %8, %cst_25 {dimension_numbers = #tpu.dot_dimension_numbers<[1], [0], [0], [1], [0, 0, 1, 1], [], []>} : vector<2x32xf32>, vector<32x128xf32>, vector<2x128xf32> -> vector<2x128xf32>
    %49 = arith.addf %47, %48 : vector<2x128xf32>
    %50 = vector.extract_strided_slice %49 {offsets = [0, 0], sizes = [2, 32], strides = [1, 1]} : vector<2x128xf32> to vector<2x32xf32>
    %51 = arith.negf %50 : vector<2x32xf32>
    %52 = math.exp %51 : vector<2x32xf32>
    %cst_26 = arith.constant 1.000000e+00 : f32
    %53 = vector.broadcast %cst_26 : f32 to vector<2x32xf32>
    %54 = arith.addf %53, %52 : vector<2x32xf32>
    %55 = arith.divf %53, %54 : vector<2x32xf32>
    %56 = vector.extract_strided_slice %49 {offsets = [0, 32], sizes = [2, 32], strides = [1, 1]} : vector<2x128xf32> to vector<2x32xf32>
    %57 = arith.negf %56 : vector<2x32xf32>
    %58 = math.exp %57 : vector<2x32xf32>
    %cst_27 = arith.constant 1.000000e+00 : f32
    %59 = vector.broadcast %cst_27 : f32 to vector<2x32xf32>
    %60 = arith.addf %59, %58 : vector<2x32xf32>
    %61 = arith.divf %59, %60 : vector<2x32xf32>
    %62 = vector.extract_strided_slice %49 {offsets = [0, 64], sizes = [2, 32], strides = [1, 1]} : vector<2x128xf32> to vector<2x32xf32>
    %63 = math.tanh %62 : vector<2x32xf32>
    %64 = vector.extract_strided_slice %49 {offsets = [0, 96], sizes = [2, 32], strides = [1, 1]} : vector<2x128xf32> to vector<2x32xf32>
    %65 = arith.negf %64 : vector<2x32xf32>
    %66 = math.exp %65 : vector<2x32xf32>
    %cst_28 = arith.constant 1.000000e+00 : f32
    %67 = vector.broadcast %cst_28 : f32 to vector<2x32xf32>
    %68 = arith.addf %67, %66 : vector<2x32xf32>
    %69 = arith.divf %67, %68 : vector<2x32xf32>
    %70 = arith.mulf %61, %38 : vector<2x32xf32>
    %71 = arith.mulf %55, %63 : vector<2x32xf32>
    %72 = arith.addf %70, %71 : vector<2x32xf32>
    %73 = math.tanh %72 : vector<2x32xf32>
    %74 = arith.mulf %69, %73 : vector<2x32xf32>
    %75 = arith.index_cast %c1_i32 : i32 to index
    %c0_29 = arith.constant 0 : index
    %c0_30 = arith.constant 0 : index
    %76 = vector.load %arg17[%75, %c0_29, %c0_30] : memref<8x2x32xf32, #tpu.memory_space<vmem>>, vector<1x2x32xf32>
    %77 = vector.shape_cast %76 : vector<1x2x32xf32> to vector<2x32xf32>
    %78 = vector.shape_cast %74 : vector<2x32xf32> to vector<1x2x32xf32>
    tpu.vector_store %arg17[%75, %c0_29, %c0_30], %78 {strides = array<i32>} : memref<8x2x32xf32, #tpu.memory_space<vmem>>, vector<1x2x32xf32>,
    %c2_i32 = arith.constant 2 : i32
    %79 = arith.index_cast %c2_i32 : i32 to index
    %c0_31 = arith.constant 0 : index
    %c0_32 = arith.constant 0 : index
    %80 = vector.load %arg19[%79, %c0_31, %c0_32] : memref<8x2x128xf32, #tpu.memory_space<vmem>>, vector<1x2x128xf32>
    %81 = vector.shape_cast %80 : vector<1x2x128xf32> to vector<2x128xf32>
    %cst_33 = arith.constant dense<0.000000e+00> : vector<2x128xf32>
    %82 = tpu.matmul %74, %8, %cst_33 {dimension_numbers = #tpu.dot_dimension_numbers<[1], [0], [0], [1], [0, 0, 1, 1], [], []>} : vector<2x32xf32>, vector<32x128xf32>, vector<2x128xf32> -> vector<2x128xf32>
    %83 = arith.addf %81, %82 : vector<2x128xf32>
    %84 = vector.extract_strided_slice %83 {offsets = [0, 0], sizes = [2, 32], strides = [1, 1]} : vector<2x128xf32> to vector<2x32xf32>
    %85 = arith.negf %84 : vector<2x32xf32>
    %86 = math.exp %85 : vector<2x32xf32>
    %cst_34 = arith.constant 1.000000e+00 : f32
    %87 = vector.broadcast %cst_34 : f32 to vector<2x32xf32>
    %88 = arith.addf %87, %86 : vector<2x32xf32>
    %89 = arith.divf %87, %88 : vector<2x32xf32>
    %90 = vector.extract_strided_slice %83 {offsets = [0, 32], sizes = [2, 32], strides = [1, 1]} : vector<2x128xf32> to vector<2x32xf32>
    %91 = arith.negf %90 : vector<2x32xf32>
    %92 = math.exp %91 : vector<2x32xf32>
    %cst_35 = arith.constant 1.000000e+00 : f32
    %93 = vector.broadcast %cst_35 : f32 to vector<2x32xf32>
    %94 = arith.addf %93, %92 : vector<2x32xf32>
    %95 = arith.divf %93, %94 : vector<2x32xf32>
    %96 = vector.extract_strided_slice %83 {offsets = [0, 64], sizes = [2, 32], strides = [1, 1]} : vector<2x128xf32> to vector<2x32xf32>
    %97 = math.tanh %96 : vector<2x32xf32>
    %98 = vector.extract_strided_slice %83 {offsets = [0, 96], sizes = [2, 32], strides = [1, 1]} : vector<2x128xf32> to vector<2x32xf32>
    %99 = arith.negf %98 : vector<2x32xf32>
    %100 = math.exp %99 : vector<2x32xf32>
    %cst_36 = arith.constant 1.000000e+00 : f32
    %101 = vector.broadcast %cst_36 : f32 to vector<2x32xf32>
    %102 = arith.addf %101, %100 : vector<2x32xf32>
    %103 = arith.divf %101, %102 : vector<2x32xf32>
    %104 = arith.mulf %95, %72 : vector<2x32xf32>
    %105 = arith.mulf %89, %97 : vector<2x32xf32>
    %106 = arith.addf %104, %105 : vector<2x32xf32>
    %107 = math.tanh %106 : vector<2x32xf32>
    %108 = arith.mulf %103, %107 : vector<2x32xf32>
    %109 = arith.index_cast %c2_i32 : i32 to index
    %c0_37 = arith.constant 0 : index
    %c0_38 = arith.constant 0 : index
    %110 = vector.load %arg17[%109, %c0_37, %c0_38] : memref<8x2x32xf32, #tpu.memory_space<vmem>>, vector<1x2x32xf32>
    %111 = vector.shape_cast %110 : vector<1x2x32xf32> to vector<2x32xf32>
    %112 = vector.shape_cast %108 : vector<2x32xf32> to vector<1x2x32xf32>
    tpu.vector_store %arg17[%109, %c0_37, %c0_38], %112 {strides = array<i32>} : memref<8x2x32xf32, #tpu.memory_space<vmem>>, vector<1x2x32xf32>,
    %c3_i32 = arith.constant 3 : i32
    %113 = arith.index_cast %c3_i32 : i32 to index
    %c0_39 = arith.constant 0 : index
    %c0_40 = arith.constant 0 : index
    %114 = vector.load %arg19[%113, %c0_39, %c0_40] : memref<8x2x128xf32, #tpu.memory_space<vmem>>, vector<1x2x128xf32>
    %115 = vector.shape_cast %114 : vector<1x2x128xf32> to vector<2x128xf32>
    %cst_41 = arith.constant dense<0.000000e+00> : vector<2x128xf32>
    %116 = tpu.matmul %108, %8, %cst_41 {dimension_numbers = #tpu.dot_dimension_numbers<[1], [0], [0], [1], [0, 0, 1, 1], [], []>} : vector<2x32xf32>, vector<32x128xf32>, vector<2x128xf32> -> vector<2x128xf32>
    %117 = arith.addf %115, %116 : vector<2x128xf32>
    %118 = vector.extract_strided_slice %117 {offsets = [0, 0], sizes = [2, 32], strides = [1, 1]} : vector<2x128xf32> to vector<2x32xf32>
    %119 = arith.negf %118 : vector<2x32xf32>
    %120 = math.exp %119 : vector<2x32xf32>
    %cst_42 = arith.constant 1.000000e+00 : f32
    %121 = vector.broadcast %cst_42 : f32 to vector<2x32xf32>
    %122 = arith.addf %121, %120 : vector<2x32xf32>
    %123 = arith.divf %121, %122 : vector<2x32xf32>
    %124 = vector.extract_strided_slice %117 {offsets = [0, 32], sizes = [2, 32], strides = [1, 1]} : vector<2x128xf32> to vector<2x32xf32>
    %125 = arith.negf %124 : vector<2x32xf32>
    %126 = math.exp %125 : vector<2x32xf32>
    %cst_43 = arith.constant 1.000000e+00 : f32
    %127 = vector.broadcast %cst_43 : f32 to vector<2x32xf32>
    %128 = arith.addf %127, %126 : vector<2x32xf32>
    %129 = arith.divf %127, %128 : vector<2x32xf32>
    %130 = vector.extract_strided_slice %117 {offsets = [0, 64], sizes = [2, 32], strides = [1, 1]} : vector<2x128xf32> to vector<2x32xf32>
    %131 = math.tanh %130 : vector<2x32xf32>
    %132 = vector.extract_strided_slice %117 {offsets = [0, 96], sizes = [2, 32], strides = [1, 1]} : vector<2x128xf32> to vector<2x32xf32>
    %133 = arith.negf %132 : vector<2x32xf32>
    %134 = math.exp %133 : vector<2x32xf32>
    %cst_44 = arith.constant 1.000000e+00 : f32
    %135 = vector.broadcast %cst_44 : f32 to vector<2x32xf32>
    %136 = arith.addf %135, %134 : vector<2x32xf32>
    %137 = arith.divf %135, %136 : vector<2x32xf32>
    %138 = arith.mulf %129, %106 : vector<2x32xf32>
    %139 = arith.mulf %123, %131 : vector<2x32xf32>
    %140 = arith.addf %138, %139 : vector<2x32xf32>
    %141 = math.tanh %140 : vector<2x32xf32>
    %142 = arith.mulf %137, %141 : vector<2x32xf32>
    %143 = arith.index_cast %c3_i32 : i32 to index
    %c0_45 = arith.constant 0 : index
    %c0_46 = arith.constant 0 : index
    %144 = vector.load %arg17[%143, %c0_45, %c0_46] : memref<8x2x32xf32, #tpu.memory_space<vmem>>, vector<1x2x32xf32>
    %145 = vector.shape_cast %144 : vector<1x2x32xf32> to vector<2x32xf32>
    %146 = vector.shape_cast %142 : vector<2x32xf32> to vector<1x2x32xf32>
    tpu.vector_store %arg17[%143, %c0_45, %c0_46], %146 {strides = array<i32>} : memref<8x2x32xf32, #tpu.memory_space<vmem>>, vector<1x2x32xf32>,
    %c4_i32 = arith.constant 4 : i32
    %147 = arith.index_cast %c4_i32 : i32 to index
    %c0_47 = arith.constant 0 : index
    %c0_48 = arith.constant 0 : index
    %148 = vector.load %arg19[%147, %c0_47, %c0_48] : memref<8x2x128xf32, #tpu.memory_space<vmem>>, vector<1x2x128xf32>
    %149 = vector.shape_cast %148 : vector<1x2x128xf32> to vector<2x128xf32>
    %cst_49 = arith.constant dense<0.000000e+00> : vector<2x128xf32>
    %150 = tpu.matmul %142, %8, %cst_49 {dimension_numbers = #tpu.dot_dimension_numbers<[1], [0], [0], [1], [0, 0, 1, 1], [], []>} : vector<2x32xf32>, vector<32x128xf32>, vector<2x128xf32> -> vector<2x128xf32>
    %151 = arith.addf %149, %150 : vector<2x128xf32>
    %152 = vector.extract_strided_slice %151 {offsets = [0, 0], sizes = [2, 32], strides = [1, 1]} : vector<2x128xf32> to vector<2x32xf32>
    %153 = arith.negf %152 : vector<2x32xf32>
    %154 = math.exp %153 : vector<2x32xf32>
    %cst_50 = arith.constant 1.000000e+00 : f32
    %155 = vector.broadcast %cst_50 : f32 to vector<2x32xf32>
    %156 = arith.addf %155, %154 : vector<2x32xf32>
    %157 = arith.divf %155, %156 : vector<2x32xf32>
    %158 = vector.extract_strided_slice %151 {offsets = [0, 32], sizes = [2, 32], strides = [1, 1]} : vector<2x128xf32> to vector<2x32xf32>
    %159 = arith.negf %158 : vector<2x32xf32>
    %160 = math.exp %159 : vector<2x32xf32>
    %cst_51 = arith.constant 1.000000e+00 : f32
    %161 = vector.broadcast %cst_51 : f32 to vector<2x32xf32>
    %162 = arith.addf %161, %160 : vector<2x32xf32>
    %163 = arith.divf %161, %162 : vector<2x32xf32>
    %164 = vector.extract_strided_slice %151 {offsets = [0, 64], sizes = [2, 32], strides = [1, 1]} : vector<2x128xf32> to vector<2x32xf32>
    %165 = math.tanh %164 : vector<2x32xf32>
    %166 = vector.extract_strided_slice %151 {offsets = [0, 96], sizes = [2, 32], strides = [1, 1]} : vector<2x128xf32> to vector<2x32xf32>
    %167 = arith.negf %166 : vector<2x32xf32>
    %168 = math.exp %167 : vector<2x32xf32>
    %cst_52 = arith.constant 1.000000e+00 : f32
    %169 = vector.broadcast %cst_52 : f32 to vector<2x32xf32>
    %170 = arith.addf %169, %168 : vector<2x32xf32>
    %171 = arith.divf %169, %170 : vector<2x32xf32>
    %172 = arith.mulf %163, %140 : vector<2x32xf32>
    %173 = arith.mulf %157, %165 : vector<2x32xf32>
    %174 = arith.addf %172, %173 : vector<2x32xf32>
    %175 = math.tanh %174 : vector<2x32xf32>
    %176 = arith.mulf %171, %175 : vector<2x32xf32>
    %177 = arith.index_cast %c4_i32 : i32 to index
    %c0_53 = arith.constant 0 : index
    %c0_54 = arith.constant 0 : index
    %178 = vector.load %arg17[%177, %c0_53, %c0_54] : memref<8x2x32xf32, #tpu.memory_space<vmem>>, vector<1x2x32xf32>
    %179 = vector.shape_cast %178 : vector<1x2x32xf32> to vector<2x32xf32>
    %180 = vector.shape_cast %176 : vector<2x32xf32> to vector<1x2x32xf32>
    tpu.vector_store %arg17[%177, %c0_53, %c0_54], %180 {strides = array<i32>} : memref<8x2x32xf32, #tpu.memory_space<vmem>>, vector<1x2x32xf32>,
    %c5_i32 = arith.constant 5 : i32
    %181 = arith.index_cast %c5_i32 : i32 to index
    %c0_55 = arith.constant 0 : index
    %c0_56 = arith.constant 0 : index
    %182 = vector.load %arg19[%181, %c0_55, %c0_56] : memref<8x2x128xf32, #tpu.memory_space<vmem>>, vector<1x2x128xf32>
    %183 = vector.shape_cast %182 : vector<1x2x128xf32> to vector<2x128xf32>
    %cst_57 = arith.constant dense<0.000000e+00> : vector<2x128xf32>
    %184 = tpu.matmul %176, %8, %cst_57 {dimension_numbers = #tpu.dot_dimension_numbers<[1], [0], [0], [1], [0, 0, 1, 1], [], []>} : vector<2x32xf32>, vector<32x128xf32>, vector<2x128xf32> -> vector<2x128xf32>
    %185 = arith.addf %183, %184 : vector<2x128xf32>
    %186 = vector.extract_strided_slice %185 {offsets = [0, 0], sizes = [2, 32], strides = [1, 1]} : vector<2x128xf32> to vector<2x32xf32>
    %187 = arith.negf %186 : vector<2x32xf32>
    %188 = math.exp %187 : vector<2x32xf32>
    %cst_58 = arith.constant 1.000000e+00 : f32
    %189 = vector.broadcast %cst_58 : f32 to vector<2x32xf32>
    %190 = arith.addf %189, %188 : vector<2x32xf32>
    %191 = arith.divf %189, %190 : vector<2x32xf32>
    %192 = vector.extract_strided_slice %185 {offsets = [0, 32], sizes = [2, 32], strides = [1, 1]} : vector<2x128xf32> to vector<2x32xf32>
    %193 = arith.negf %192 : vector<2x32xf32>
    %194 = math.exp %193 : vector<2x32xf32>
    %cst_59 = arith.constant 1.000000e+00 : f32
    %195 = vector.broadcast %cst_59 : f32 to vector<2x32xf32>
    %196 = arith.addf %195, %194 : vector<2x32xf32>
    %197 = arith.divf %195, %196 : vector<2x32xf32>
    %198 = vector.extract_strided_slice %185 {offsets = [0, 64], sizes = [2, 32], strides = [1, 1]} : vector<2x128xf32> to vector<2x32xf32>
    %199 = math.tanh %198 : vector<2x32xf32>
    %200 = vector.extract_strided_slice %185 {offsets = [0, 96], sizes = [2, 32], strides = [1, 1]} : vector<2x128xf32> to vector<2x32xf32>
    %201 = arith.negf %200 : vector<2x32xf32>
    %202 = math.exp %201 : vector<2x32xf32>
    %cst_60 = arith.constant 1.000000e+00 : f32
    %203 = vector.broadcast %cst_60 : f32 to vector<2x32xf32>
    %204 = arith.addf %203, %202 : vector<2x32xf32>
    %205 = arith.divf %203, %204 : vector<2x32xf32>
    %206 = arith.mulf %197, %174 : vector<2x32xf32>
    %207 = arith.mulf %191, %199 : vector<2x32xf32>
    %208 = arith.addf %206, %207 : vector<2x32xf32>
    %209 = math.tanh %208 : vector<2x32xf32>
    %210 = arith.mulf %205, %209 : vector<2x32xf32>
    %211 = arith.index_cast %c5_i32 : i32 to index
    %c0_61 = arith.constant 0 : index
    %c0_62 = arith.constant 0 : index
    %212 = vector.load %arg17[%211, %c0_61, %c0_62] : memref<8x2x32xf32, #tpu.memory_space<vmem>>, vector<1x2x32xf32>
    %213 = vector.shape_cast %212 : vector<1x2x32xf32> to vector<2x32xf32>
    %214 = vector.shape_cast %210 : vector<2x32xf32> to vector<1x2x32xf32>
    tpu.vector_store %arg17[%211, %c0_61, %c0_62], %214 {strides = array<i32>} : memref<8x2x32xf32, #tpu.memory_space<vmem>>, vector<1x2x32xf32>,
    %c6_i32 = arith.constant 6 : i32
    %215 = arith.index_cast %c6_i32 : i32 to index
    %c0_63 = arith.constant 0 : index
    %c0_64 = arith.constant 0 : index
    %216 = vector.load %arg19[%215, %c0_63, %c0_64] : memref<8x2x128xf32, #tpu.memory_space<vmem>>, vector<1x2x128xf32>
    %217 = vector.shape_cast %216 : vector<1x2x128xf32> to vector<2x128xf32>
    %cst_65 = arith.constant dense<0.000000e+00> : vector<2x128xf32>
    %218 = tpu.matmul %210, %8, %cst_65 {dimension_numbers = #tpu.dot_dimension_numbers<[1], [0], [0], [1], [0, 0, 1, 1], [], []>} : vector<2x32xf32>, vector<32x128xf32>, vector<2x128xf32> -> vector<2x128xf32>
    %219 = arith.addf %217, %218 : vector<2x128xf32>
    %220 = vector.extract_strided_slice %219 {offsets = [0, 0], sizes = [2, 32], strides = [1, 1]} : vector<2x128xf32> to vector<2x32xf32>
    %221 = arith.negf %220 : vector<2x32xf32>
    %222 = math.exp %221 : vector<2x32xf32>
    %cst_66 = arith.constant 1.000000e+00 : f32
    %223 = vector.broadcast %cst_66 : f32 to vector<2x32xf32>
    %224 = arith.addf %223, %222 : vector<2x32xf32>
    %225 = arith.divf %223, %224 : vector<2x32xf32>
    %226 = vector.extract_strided_slice %219 {offsets = [0, 32], sizes = [2, 32], strides = [1, 1]} : vector<2x128xf32> to vector<2x32xf32>
    %227 = arith.negf %226 : vector<2x32xf32>
    %228 = math.exp %227 : vector<2x32xf32>
    %cst_67 = arith.constant 1.000000e+00 : f32
    %229 = vector.broadcast %cst_67 : f32 to vector<2x32xf32>
    %230 = arith.addf %229, %228 : vector<2x32xf32>
    %231 = arith.divf %229, %230 : vector<2x32xf32>
    %232 = vector.extract_strided_slice %219 {offsets = [0, 64], sizes = [2, 32], strides = [1, 1]} : vector<2x128xf32> to vector<2x32xf32>
    %233 = math.tanh %232 : vector<2x32xf32>
    %234 = vector.extract_strided_slice %219 {offsets = [0, 96], sizes = [2, 32], strides = [1, 1]} : vector<2x128xf32> to vector<2x32xf32>
    %235 = arith.negf %234 : vector<2x32xf32>
    %236 = math.exp %235 : vector<2x32xf32>
    %cst_68 = arith.constant 1.000000e+00 : f32
    %237 = vector.broadcast %cst_68 : f32 to vector<2x32xf32>
    %238 = arith.addf %237, %236 : vector<2x32xf32>
    %239 = arith.divf %237, %238 : vector<2x32xf32>
    %240 = arith.mulf %231, %208 : vector<2x32xf32>
    %241 = arith.mulf %225, %233 : vector<2x32xf32>
    %242 = arith.addf %240, %241 : vector<2x32xf32>
    %243 = math.tanh %242 : vector<2x32xf32>
    %244 = arith.mulf %239, %243 : vector<2x32xf32>
    %245 = arith.index_cast %c6_i32 : i32 to index
    %c0_69 = arith.constant 0 : index
    %c0_70 = arith.constant 0 : index
    %246 = vector.load %arg17[%245, %c0_69, %c0_70] : memref<8x2x32xf32, #tpu.memory_space<vmem>>, vector<1x2x32xf32>
    %247 = vector.shape_cast %246 : vector<1x2x32xf32> to vector<2x32xf32>
    %248 = vector.shape_cast %244 : vector<2x32xf32> to vector<1x2x32xf32>
    tpu.vector_store %arg17[%245, %c0_69, %c0_70], %248 {strides = array<i32>} : memref<8x2x32xf32, #tpu.memory_space<vmem>>, vector<1x2x32xf32>,
    %c7_i32 = arith.constant 7 : i32
    %249 = arith.index_cast %c7_i32 : i32 to index
    %c0_71 = arith.constant 0 : index
    %c0_72 = arith.constant 0 : index
    %250 = vector.load %arg19[%249, %c0_71, %c0_72] : memref<8x2x128xf32, #tpu.memory_space<vmem>>, vector<1x2x128xf32>
    %251 = vector.shape_cast %250 : vector<1x2x128xf32> to vector<2x128xf32>
    %cst_73 = arith.constant dense<0.000000e+00> : vector<2x128xf32>
    %252 = tpu.matmul %244, %8, %cst_73 {dimension_numbers = #tpu.dot_dimension_numbers<[1], [0], [0], [1], [0, 0, 1, 1], [], []>} : vector<2x32xf32>, vector<32x128xf32>, vector<2x128xf32> -> vector<2x128xf32>
    %253 = arith.addf %251, %252 : vector<2x128xf32>
    %254 = vector.extract_strided_slice %253 {offsets = [0, 0], sizes = [2, 32], strides = [1, 1]} : vector<2x128xf32> to vector<2x32xf32>
    %255 = arith.negf %254 : vector<2x32xf32>
    %256 = math.exp %255 : vector<2x32xf32>
    %cst_74 = arith.constant 1.000000e+00 : f32
    %257 = vector.broadcast %cst_74 : f32 to vector<2x32xf32>
    %258 = arith.addf %257, %256 : vector<2x32xf32>
    %259 = arith.divf %257, %258 : vector<2x32xf32>
    %260 = vector.extract_strided_slice %253 {offsets = [0, 32], sizes = [2, 32], strides = [1, 1]} : vector<2x128xf32> to vector<2x32xf32>
    %261 = arith.negf %260 : vector<2x32xf32>
    %262 = math.exp %261 : vector<2x32xf32>
    %cst_75 = arith.constant 1.000000e+00 : f32
    %263 = vector.broadcast %cst_75 : f32 to vector<2x32xf32>
    %264 = arith.addf %263, %262 : vector<2x32xf32>
    %265 = arith.divf %263, %264 : vector<2x32xf32>
    %266 = vector.extract_strided_slice %253 {offsets = [0, 64], sizes = [2, 32], strides = [1, 1]} : vector<2x128xf32> to vector<2x32xf32>
    %267 = math.tanh %266 : vector<2x32xf32>
    %268 = vector.extract_strided_slice %253 {offsets = [0, 96], sizes = [2, 32], strides = [1, 1]} : vector<2x128xf32> to vector<2x32xf32>
    %269 = arith.negf %268 : vector<2x32xf32>
    %270 = math.exp %269 : vector<2x32xf32>
    %cst_76 = arith.constant 1.000000e+00 : f32
    %271 = vector.broadcast %cst_76 : f32 to vector<2x32xf32>
    %272 = arith.addf %271, %270 : vector<2x32xf32>
    %273 = arith.divf %271, %272 : vector<2x32xf32>
    %274 = arith.mulf %265, %242 : vector<2x32xf32>
    %275 = arith.mulf %259, %267 : vector<2x32xf32>
    %276 = arith.addf %274, %275 : vector<2x32xf32>
    %277 = math.tanh %276 : vector<2x32xf32>
    %278 = arith.mulf %273, %277 : vector<2x32xf32>
    %279 = arith.index_cast %c7_i32 : i32 to index
    %c0_77 = arith.constant 0 : index
    %c0_78 = arith.constant 0 : index
    %280 = vector.load %arg17[%279, %c0_77, %c0_78] : memref<8x2x32xf32, #tpu.memory_space<vmem>>, vector<1x2x32xf32>
    %281 = vector.shape_cast %280 : vector<1x2x32xf32> to vector<2x32xf32>
    %282 = vector.shape_cast %278 : vector<2x32xf32> to vector<1x2x32xf32>
    tpu.vector_store %arg17[%279, %c0_77, %c0_78], %282 {strides = array<i32>} : memref<8x2x32xf32, #tpu.memory_space<vmem>>, vector<1x2x32xf32>,
    %c8_i32 = arith.constant 8 : i32
    %c0_79 = arith.constant 0 : index
    %c0_80 = arith.constant 0 : index
    %c0_81 = arith.constant 0 : index
    %283 = vector.load %arg17[%c0_79, %c0_80, %c0_81] : memref<8x2x32xf32, #tpu.memory_space<vmem>>, vector<8x2x32xf32>
    %c0_82 = arith.constant 0 : index
    %c0_83 = arith.constant 0 : index
    %284 = vector.load %arg7[%c0_82, %c0_83] : memref<32x128xf32, #tpu.memory_space<vmem>>, vector<32x128xf32>
    "tpu.trace_start"() <{level = 10 : i32, message = "tbe,ef->tbf"}> : () -> ()
    %cst_84 = arith.constant dense<0.000000e+00> : vector<8x2x128xf32>
    %285 = tpu.matmul %283, %284, %cst_84 {dimension_numbers = #tpu.dot_dimension_numbers<[2], [0], [0, 1], [1], [0, 0, 0, 1, 1, 1], [], []>} : vector<8x2x32xf32>, vector<32x128xf32>, vector<8x2x128xf32> -> vector<8x2x128xf32>
    "tpu.trace_stop"() : () -> ()
    %c0_85 = arith.constant 0 : index
    %c0_86 = arith.constant 0 : index
    %286 = vector.load %arg9[%c0_85, %c0_86] : memref<1x128xf32, #tpu.memory_space<vmem>>, vector<1x128xf32>
    %287 = vector.shape_cast %286 : vector<1x128xf32> to vector<1x1x128xf32>
    %288 = vector.broadcast %287 : vector<1x1x128xf32> to vector<8x2x128xf32>
    %289 = arith.addf %285, %288 : vector<8x2x128xf32>
    %c0_87 = arith.constant 0 : index
    %c0_88 = arith.constant 0 : index
    %c0_89 = arith.constant 0 : index
    %290 = vector.load %arg19[%c0_87, %c0_88, %c0_89] : memref<8x2x128xf32, #tpu.memory_space<vmem>>, vector<8x2x128xf32>
    tpu.vector_store %arg19[%c0_87, %c0_88, %c0_89], %289 {strides = array<i32>} : memref<8x2x128xf32, #tpu.memory_space<vmem>>, vector<8x2x128xf32>,
    %c0_90 = arith.constant 0 : index
    %c0_91 = arith.constant 0 : index
    %291 = vector.load %arg8[%c0_90, %c0_91] : memref<32x128xf32, #tpu.memory_space<vmem>>, vector<32x128xf32>
    %c0_92 = arith.constant 0 : index
    %c0_93 = arith.constant 0 : index
    %292 = vector.load %arg10[%c0_92, %c0_93] : memref<2x32xf32, #tpu.memory_space<vmem>>, vector<2x32xf32>
    %c0_94 = arith.constant 0 : index
    %c0_95 = arith.constant 0 : index
    %293 = vector.load %arg11[%c0_94, %c0_95] : memref<2x32xf32, #tpu.memory_space<vmem>>, vector<2x32xf32>
    %c0_i32_96 = arith.constant 0 : i32
    %294 = arith.index_cast %c0_i32_96 : i32 to index
    %c0_97 = arith.constant 0 : index
    %c0_98 = arith.constant 0 : index
    %295 = vector.load %arg19[%294, %c0_97, %c0_98] : memref<8x2x128xf32, #tpu.memory_space<vmem>>, vector<1x2x128xf32>
    %296 = vector.shape_cast %295 : vector<1x2x128xf32> to vector<2x128xf32>
    %cst_99 = arith.constant dense<0.000000e+00> : vector<2x128xf32>
    %297 = tpu.matmul %292, %291, %cst_99 {dimension_numbers = #tpu.dot_dimension_numbers<[1], [0], [0], [1], [0, 0, 1, 1], [], []>} : vector<2x32xf32>, vector<32x128xf32>, vector<2x128xf32> -> vector<2x128xf32>
    %298 = arith.addf %296, %297 : vector<2x128xf32>
    %299 = vector.extract_strided_slice %298 {offsets = [0, 0], sizes = [2, 32], strides = [1, 1]} : vector<2x128xf32> to vector<2x32xf32>
    %300 = arith.negf %299 : vector<2x32xf32>
    %301 = math.exp %300 : vector<2x32xf32>
    %cst_100 = arith.constant 1.000000e+00 : f32
    %302 = vector.broadcast %cst_100 : f32 to vector<2x32xf32>
    %303 = arith.addf %302, %301 : vector<2x32xf32>
    %304 = arith.divf %302, %303 : vector<2x32xf32>
    %305 = vector.extract_strided_slice %298 {offsets = [0, 32], sizes = [2, 32], strides = [1, 1]} : vector<2x128xf32> to vector<2x32xf32>
    %306 = arith.negf %305 : vector<2x32xf32>
    %307 = math.exp %306 : vector<2x32xf32>
    %cst_101 = arith.constant 1.000000e+00 : f32
    %308 = vector.broadcast %cst_101 : f32 to vector<2x32xf32>
    %309 = arith.addf %308, %307 : vector<2x32xf32>
    %310 = arith.divf %308, %309 : vector<2x32xf32>
    %311 = vector.extract_strided_slice %298 {offsets = [0, 64], sizes = [2, 32], strides = [1, 1]} : vector<2x128xf32> to vector<2x32xf32>
    %312 = math.tanh %311 : vector<2x32xf32>
    %313 = vector.extract_strided_slice %298 {offsets = [0, 96], sizes = [2, 32], strides = [1, 1]} : vector<2x128xf32> to vector<2x32xf32>
    %314 = arith.negf %313 : vector<2x32xf32>
    %315 = math.exp %314 : vector<2x32xf32>
    %cst_102 = arith.constant 1.000000e+00 : f32
    %316 = vector.broadcast %cst_102 : f32 to vector<2x32xf32>
    %317 = arith.addf %316, %315 : vector<2x32xf32>
    %318 = arith.divf %316, %317 : vector<2x32xf32>
    %319 = arith.mulf %310, %293 : vector<2x32xf32>
    %320 = arith.mulf %304, %312 : vector<2x32xf32>
    %321 = arith.addf %319, %320 : vector<2x32xf32>
    %322 = math.tanh %321 : vector<2x32xf32>
    %323 = arith.mulf %318, %322 : vector<2x32xf32>
    %324 = arith.index_cast %c0_i32_96 : i32 to index
    %c0_103 = arith.constant 0 : index
    %c0_104 = arith.constant 0 : index
    %325 = vector.load %arg18[%324, %c0_103, %c0_104] : memref<8x2x32xf32, #tpu.memory_space<vmem>>, vector<1x2x32xf32>
    %326 = vector.shape_cast %325 : vector<1x2x32xf32> to vector<2x32xf32>
    %327 = vector.shape_cast %323 : vector<2x32xf32> to vector<1x2x32xf32>
    tpu.vector_store %arg18[%324, %c0_103, %c0_104], %327 {strides = array<i32>} : memref<8x2x32xf32, #tpu.memory_space<vmem>>, vector<1x2x32xf32>,
    %c1_i32_105 = arith.constant 1 : i32
    %328 = arith.index_cast %c1_i32_105 : i32 to index
    %c0_106 = arith.constant 0 : index
    %c0_107 = arith.constant 0 : index
    %329 = vector.load %arg19[%328, %c0_106, %c0_107] : memref<8x2x128xf32, #tpu.memory_space<vmem>>, vector<1x2x128xf32>
    %330 = vector.shape_cast %329 : vector<1x2x128xf32> to vector<2x128xf32>
    %cst_108 = arith.constant dense<0.000000e+00> : vector<2x128xf32>
    %331 = tpu.matmul %323, %291, %cst_108 {dimension_numbers = #tpu.dot_dimension_numbers<[1], [0], [0], [1], [0, 0, 1, 1], [], []>} : vector<2x32xf32>, vector<32x128xf32>, vector<2x128xf32> -> vector<2x128xf32>
    %332 = arith.addf %330, %331 : vector<2x128xf32>
    %333 = vector.extract_strided_slice %332 {offsets = [0, 0], sizes = [2, 32], strides = [1, 1]} : vector<2x128xf32> to vector<2x32xf32>
    %334 = arith.negf %333 : vector<2x32xf32>
    %335 = math.exp %334 : vector<2x32xf32>
    %cst_109 = arith.constant 1.000000e+00 : f32
    %336 = vector.broadcast %cst_109 : f32 to vector<2x32xf32>
    %337 = arith.addf %336, %335 : vector<2x32xf32>
    %338 = arith.divf %336, %337 : vector<2x32xf32>
    %339 = vector.extract_strided_slice %332 {offsets = [0, 32], sizes = [2, 32], strides = [1, 1]} : vector<2x128xf32> to vector<2x32xf32>
    %340 = arith.negf %339 : vector<2x32xf32>
    %341 = math.exp %340 : vector<2x32xf32>
    %cst_110 = arith.constant 1.000000e+00 : f32
    %342 = vector.broadcast %cst_110 : f32 to vector<2x32xf32>
    %343 = arith.addf %342, %341 : vector<2x32xf32>
    %344 = arith.divf %342, %343 : vector<2x32xf32>
    %345 = vector.extract_strided_slice %332 {offsets = [0, 64], sizes = [2, 32], strides = [1, 1]} : vector<2x128xf32> to vector<2x32xf32>
    %346 = math.tanh %345 : vector<2x32xf32>
    %347 = vector.extract_strided_slice %332 {offsets = [0, 96], sizes = [2, 32], strides = [1, 1]} : vector<2x128xf32> to vector<2x32xf32>
    %348 = arith.negf %347 : vector<2x32xf32>
    %349 = math.exp %348 : vector<2x32xf32>
    %cst_111 = arith.constant 1.000000e+00 : f32
    %350 = vector.broadcast %cst_111 : f32 to vector<2x32xf32>
    %351 = arith.addf %350, %349 : vector<2x32xf32>
    %352 = arith.divf %350, %351 : vector<2x32xf32>
    %353 = arith.mulf %344, %321 : vector<2x32xf32>
    %354 = arith.mulf %338, %346 : vector<2x32xf32>
    %355 = arith.addf %353, %354 : vector<2x32xf32>
    %356 = math.tanh %355 : vector<2x32xf32>
    %357 = arith.mulf %352, %356 : vector<2x32xf32>
    %358 = arith.index_cast %c1_i32_105 : i32 to index
    %c0_112 = arith.constant 0 : index
    %c0_113 = arith.constant 0 : index
    %359 = vector.load %arg18[%358, %c0_112, %c0_113] : memref<8x2x32xf32, #tpu.memory_space<vmem>>, vector<1x2x32xf32>
    %360 = vector.shape_cast %359 : vector<1x2x32xf32> to vector<2x32xf32>
    %361 = vector.shape_cast %357 : vector<2x32xf32> to vector<1x2x32xf32>
    tpu.vector_store %arg18[%358, %c0_112, %c0_113], %361 {strides = array<i32>} : memref<8x2x32xf32, #tpu.memory_space<vmem>>, vector<1x2x32xf32>,
    %c2_i32_114 = arith.constant 2 : i32
    %362 = arith.index_cast %c2_i32_114 : i32 to index
    %c0_115 = arith.constant 0 : index
    %c0_116 = arith.constant 0 : index
    %363 = vector.load %arg19[%362, %c0_115, %c0_116] : memref<8x2x128xf32, #tpu.memory_space<vmem>>, vector<1x2x128xf32>
    %364 = vector.shape_cast %363 : vector<1x2x128xf32> to vector<2x128xf32>
    %cst_117 = arith.constant dense<0.000000e+00> : vector<2x128xf32>
    %365 = tpu.matmul %357, %291, %cst_117 {dimension_numbers = #tpu.dot_dimension_numbers<[1], [0], [0], [1], [0, 0, 1, 1], [], []>} : vector<2x32xf32>, vector<32x128xf32>, vector<2x128xf32> -> vector<2x128xf32>
    %366 = arith.addf %364, %365 : vector<2x128xf32>
    %367 = vector.extract_strided_slice %366 {offsets = [0, 0], sizes = [2, 32], strides = [1, 1]} : vector<2x128xf32> to vector<2x32xf32>
    %368 = arith.negf %367 : vector<2x32xf32>
    %369 = math.exp %368 : vector<2x32xf32>
    %cst_118 = arith.constant 1.000000e+00 : f32
    %370 = vector.broadcast %cst_118 : f32 to vector<2x32xf32>
    %371 = arith.addf %370, %369 : vector<2x32xf32>
    %372 = arith.divf %370, %371 : vector<2x32xf32>
    %373 = vector.extract_strided_slice %366 {offsets = [0, 32], sizes = [2, 32], strides = [1, 1]} : vector<2x128xf32> to vector<2x32xf32>
    %374 = arith.negf %373 : vector<2x32xf32>
    %375 = math.exp %374 : vector<2x32xf32>
    %cst_119 = arith.constant 1.000000e+00 : f32
    %376 = vector.broadcast %cst_119 : f32 to vector<2x32xf32>
    %377 = arith.addf %376, %375 : vector<2x32xf32>
    %378 = arith.divf %376, %377 : vector<2x32xf32>
    %379 = vector.extract_strided_slice %366 {offsets = [0, 64], sizes = [2, 32], strides = [1, 1]} : vector<2x128xf32> to vector<2x32xf32>
    %380 = math.tanh %379 : vector<2x32xf32>
    %381 = vector.extract_strided_slice %366 {offsets = [0, 96], sizes = [2, 32], strides = [1, 1]} : vector<2x128xf32> to vector<2x32xf32>
    %382 = arith.negf %381 : vector<2x32xf32>
    %383 = math.exp %382 : vector<2x32xf32>
    %cst_120 = arith.constant 1.000000e+00 : f32
    %384 = vector.broadcast %cst_120 : f32 to vector<2x32xf32>
    %385 = arith.addf %384, %383 : vector<2x32xf32>
    %386 = arith.divf %384, %385 : vector<2x32xf32>
    %387 = arith.mulf %378, %355 : vector<2x32xf32>
    %388 = arith.mulf %372, %380 : vector<2x32xf32>
    %389 = arith.addf %387, %388 : vector<2x32xf32>
    %390 = math.tanh %389 : vector<2x32xf32>
    %391 = arith.mulf %386, %390 : vector<2x32xf32>
    %392 = arith.index_cast %c2_i32_114 : i32 to index
    %c0_121 = arith.constant 0 : index
    %c0_122 = arith.constant 0 : index
    %393 = vector.load %arg18[%392, %c0_121, %c0_122] : memref<8x2x32xf32, #tpu.memory_space<vmem>>, vector<1x2x32xf32>
    %394 = vector.shape_cast %393 : vector<1x2x32xf32> to vector<2x32xf32>
    %395 = vector.shape_cast %391 : vector<2x32xf32> to vector<1x2x32xf32>
    tpu.vector_store %arg18[%392, %c0_121, %c0_122], %395 {strides = array<i32>} : memref<8x2x32xf32, #tpu.memory_space<vmem>>, vector<1x2x32xf32>,
    %c3_i32_123 = arith.constant 3 : i32
    %396 = arith.index_cast %c3_i32_123 : i32 to index
    %c0_124 = arith.constant 0 : index
    %c0_125 = arith.constant 0 : index
    %397 = vector.load %arg19[%396, %c0_124, %c0_125] : memref<8x2x128xf32, #tpu.memory_space<vmem>>, vector<1x2x128xf32>
    %398 = vector.shape_cast %397 : vector<1x2x128xf32> to vector<2x128xf32>
    %cst_126 = arith.constant dense<0.000000e+00> : vector<2x128xf32>
    %399 = tpu.matmul %391, %291, %cst_126 {dimension_numbers = #tpu.dot_dimension_numbers<[1], [0], [0], [1], [0, 0, 1, 1], [], []>} : vector<2x32xf32>, vector<32x128xf32>, vector<2x128xf32> -> vector<2x128xf32>
    %400 = arith.addf %398, %399 : vector<2x128xf32>
    %401 = vector.extract_strided_slice %400 {offsets = [0, 0], sizes = [2, 32], strides = [1, 1]} : vector<2x128xf32> to vector<2x32xf32>
    %402 = arith.negf %401 : vector<2x32xf32>
    %403 = math.exp %402 : vector<2x32xf32>
    %cst_127 = arith.constant 1.000000e+00 : f32
    %404 = vector.broadcast %cst_127 : f32 to vector<2x32xf32>
    %405 = arith.addf %404, %403 : vector<2x32xf32>
    %406 = arith.divf %404, %405 : vector<2x32xf32>
    %407 = vector.extract_strided_slice %400 {offsets = [0, 32], sizes = [2, 32], strides = [1, 1]} : vector<2x128xf32> to vector<2x32xf32>
    %408 = arith.negf %407 : vector<2x32xf32>
    %409 = math.exp %408 : vector<2x32xf32>
    %cst_128 = arith.constant 1.000000e+00 : f32
    %410 = vector.broadcast %cst_128 : f32 to vector<2x32xf32>
    %411 = arith.addf %410, %409 : vector<2x32xf32>
    %412 = arith.divf %410, %411 : vector<2x32xf32>
    %413 = vector.extract_strided_slice %400 {offsets = [0, 64], sizes = [2, 32], strides = [1, 1]} : vector<2x128xf32> to vector<2x32xf32>
    %414 = math.tanh %413 : vector<2x32xf32>
    %415 = vector.extract_strided_slice %400 {offsets = [0, 96], sizes = [2, 32], strides = [1, 1]} : vector<2x128xf32> to vector<2x32xf32>
    %416 = arith.negf %415 : vector<2x32xf32>
    %417 = math.exp %416 : vector<2x32xf32>
    %cst_129 = arith.constant 1.000000e+00 : f32
    %418 = vector.broadcast %cst_129 : f32 to vector<2x32xf32>
    %419 = arith.addf %418, %417 : vector<2x32xf32>
    %420 = arith.divf %418, %419 : vector<2x32xf32>
    %421 = arith.mulf %412, %389 : vector<2x32xf32>
    %422 = arith.mulf %406, %414 : vector<2x32xf32>
    %423 = arith.addf %421, %422 : vector<2x32xf32>
    %424 = math.tanh %423 : vector<2x32xf32>
    %425 = arith.mulf %420, %424 : vector<2x32xf32>
    %426 = arith.index_cast %c3_i32_123 : i32 to index
    %c0_130 = arith.constant 0 : index
    %c0_131 = arith.constant 0 : index
    %427 = vector.load %arg18[%426, %c0_130, %c0_131] : memref<8x2x32xf32, #tpu.memory_space<vmem>>, vector<1x2x32xf32>
    %428 = vector.shape_cast %427 : vector<1x2x32xf32> to vector<2x32xf32>
    %429 = vector.shape_cast %425 : vector<2x32xf32> to vector<1x2x32xf32>
    tpu.vector_store %arg18[%426, %c0_130, %c0_131], %429 {strides = array<i32>} : memref<8x2x32xf32, #tpu.memory_space<vmem>>, vector<1x2x32xf32>,
    %c4_i32_132 = arith.constant 4 : i32
    %430 = arith.index_cast %c4_i32_132 : i32 to index
    %c0_133 = arith.constant 0 : index
    %c0_134 = arith.constant 0 : index
    %431 = vector.load %arg19[%430, %c0_133, %c0_134] : memref<8x2x128xf32, #tpu.memory_space<vmem>>, vector<1x2x128xf32>
    %432 = vector.shape_cast %431 : vector<1x2x128xf32> to vector<2x128xf32>
    %cst_135 = arith.constant dense<0.000000e+00> : vector<2x128xf32>
    %433 = tpu.matmul %425, %291, %cst_135 {dimension_numbers = #tpu.dot_dimension_numbers<[1], [0], [0], [1], [0, 0, 1, 1], [], []>} : vector<2x32xf32>, vector<32x128xf32>, vector<2x128xf32> -> vector<2x128xf32>
    %434 = arith.addf %432, %433 : vector<2x128xf32>
    %435 = vector.extract_strided_slice %434 {offsets = [0, 0], sizes = [2, 32], strides = [1, 1]} : vector<2x128xf32> to vector<2x32xf32>
    %436 = arith.negf %435 : vector<2x32xf32>
    %437 = math.exp %436 : vector<2x32xf32>
    %cst_136 = arith.constant 1.000000e+00 : f32
    %438 = vector.broadcast %cst_136 : f32 to vector<2x32xf32>
    %439 = arith.addf %438, %437 : vector<2x32xf32>
    %440 = arith.divf %438, %439 : vector<2x32xf32>
    %441 = vector.extract_strided_slice %434 {offsets = [0, 32], sizes = [2, 32], strides = [1, 1]} : vector<2x128xf32> to vector<2x32xf32>
    %442 = arith.negf %441 : vector<2x32xf32>
    %443 = math.exp %442 : vector<2x32xf32>
    %cst_137 = arith.constant 1.000000e+00 : f32
    %444 = vector.broadcast %cst_137 : f32 to vector<2x32xf32>
    %445 = arith.addf %444, %443 : vector<2x32xf32>
    %446 = arith.divf %444, %445 : vector<2x32xf32>
    %447 = vector.extract_strided_slice %434 {offsets = [0, 64], sizes = [2, 32], strides = [1, 1]} : vector<2x128xf32> to vector<2x32xf32>
    %448 = math.tanh %447 : vector<2x32xf32>
    %449 = vector.extract_strided_slice %434 {offsets = [0, 96], sizes = [2, 32], strides = [1, 1]} : vector<2x128xf32> to vector<2x32xf32>
    %450 = arith.negf %449 : vector<2x32xf32>
    %451 = math.exp %450 : vector<2x32xf32>
    %cst_138 = arith.constant 1.000000e+00 : f32
    %452 = vector.broadcast %cst_138 : f32 to vector<2x32xf32>
    %453 = arith.addf %452, %451 : vector<2x32xf32>
    %454 = arith.divf %452, %453 : vector<2x32xf32>
    %455 = arith.mulf %446, %423 : vector<2x32xf32>
    %456 = arith.mulf %440, %448 : vector<2x32xf32>
    %457 = arith.addf %455, %456 : vector<2x32xf32>
    %458 = math.tanh %457 : vector<2x32xf32>
    %459 = arith.mulf %454, %458 : vector<2x32xf32>
    %460 = arith.index_cast %c4_i32_132 : i32 to index
    %c0_139 = arith.constant 0 : index
    %c0_140 = arith.constant 0 : index
    %461 = vector.load %arg18[%460, %c0_139, %c0_140] : memref<8x2x32xf32, #tpu.memory_space<vmem>>, vector<1x2x32xf32>
    %462 = vector.shape_cast %461 : vector<1x2x32xf32> to vector<2x32xf32>
    %463 = vector.shape_cast %459 : vector<2x32xf32> to vector<1x2x32xf32>
    tpu.vector_store %arg18[%460, %c0_139, %c0_140], %463 {strides = array<i32>} : memref<8x2x32xf32, #tpu.memory_space<vmem>>, vector<1x2x32xf32>,
    %c5_i32_141 = arith.constant 5 : i32
    %464 = arith.index_cast %c5_i32_141 : i32 to index
    %c0_142 = arith.constant 0 : index
    %c0_143 = arith.constant 0 : index
    %465 = vector.load %arg19[%464, %c0_142, %c0_143] : memref<8x2x128xf32, #tpu.memory_space<vmem>>, vector<1x2x128xf32>
    %466 = vector.shape_cast %465 : vector<1x2x128xf32> to vector<2x128xf32>
    %cst_144 = arith.constant dense<0.000000e+00> : vector<2x128xf32>
    %467 = tpu.matmul %459, %291, %cst_144 {dimension_numbers = #tpu.dot_dimension_numbers<[1], [0], [0], [1], [0, 0, 1, 1], [], []>} : vector<2x32xf32>, vector<32x128xf32>, vector<2x128xf32> -> vector<2x128xf32>
    %468 = arith.addf %466, %467 : vector<2x128xf32>
    %469 = vector.extract_strided_slice %468 {offsets = [0, 0], sizes = [2, 32], strides = [1, 1]} : vector<2x128xf32> to vector<2x32xf32>
    %470 = arith.negf %469 : vector<2x32xf32>
    %471 = math.exp %470 : vector<2x32xf32>
    %cst_145 = arith.constant 1.000000e+00 : f32
    %472 = vector.broadcast %cst_145 : f32 to vector<2x32xf32>
    %473 = arith.addf %472, %471 : vector<2x32xf32>
    %474 = arith.divf %472, %473 : vector<2x32xf32>
    %475 = vector.extract_strided_slice %468 {offsets = [0, 32], sizes = [2, 32], strides = [1, 1]} : vector<2x128xf32> to vector<2x32xf32>
    %476 = arith.negf %475 : vector<2x32xf32>
    %477 = math.exp %476 : vector<2x32xf32>
    %cst_146 = arith.constant 1.000000e+00 : f32
    %478 = vector.broadcast %cst_146 : f32 to vector<2x32xf32>
    %479 = arith.addf %478, %477 : vector<2x32xf32>
    %480 = arith.divf %478, %479 : vector<2x32xf32>
    %481 = vector.extract_strided_slice %468 {offsets = [0, 64], sizes = [2, 32], strides = [1, 1]} : vector<2x128xf32> to vector<2x32xf32>
    %482 = math.tanh %481 : vector<2x32xf32>
    %483 = vector.extract_strided_slice %468 {offsets = [0, 96], sizes = [2, 32], strides = [1, 1]} : vector<2x128xf32> to vector<2x32xf32>
    %484 = arith.negf %483 : vector<2x32xf32>
    %485 = math.exp %484 : vector<2x32xf32>
    %cst_147 = arith.constant 1.000000e+00 : f32
    %486 = vector.broadcast %cst_147 : f32 to vector<2x32xf32>
    %487 = arith.addf %486, %485 : vector<2x32xf32>
    %488 = arith.divf %486, %487 : vector<2x32xf32>
    %489 = arith.mulf %480, %457 : vector<2x32xf32>
    %490 = arith.mulf %474, %482 : vector<2x32xf32>
    %491 = arith.addf %489, %490 : vector<2x32xf32>
    %492 = math.tanh %491 : vector<2x32xf32>
    %493 = arith.mulf %488, %492 : vector<2x32xf32>
    %494 = arith.index_cast %c5_i32_141 : i32 to index
    %c0_148 = arith.constant 0 : index
    %c0_149 = arith.constant 0 : index
    %495 = vector.load %arg18[%494, %c0_148, %c0_149] : memref<8x2x32xf32, #tpu.memory_space<vmem>>, vector<1x2x32xf32>
    %496 = vector.shape_cast %495 : vector<1x2x32xf32> to vector<2x32xf32>
    %497 = vector.shape_cast %493 : vector<2x32xf32> to vector<1x2x32xf32>
    tpu.vector_store %arg18[%494, %c0_148, %c0_149], %497 {strides = array<i32>} : memref<8x2x32xf32, #tpu.memory_space<vmem>>, vector<1x2x32xf32>,
    %c6_i32_150 = arith.constant 6 : i32
    %498 = arith.index_cast %c6_i32_150 : i32 to index
    %c0_151 = arith.constant 0 : index
    %c0_152 = arith.constant 0 : index
    %499 = vector.load %arg19[%498, %c0_151, %c0_152] : memref<8x2x128xf32, #tpu.memory_space<vmem>>, vector<1x2x128xf32>
    %500 = vector.shape_cast %499 : vector<1x2x128xf32> to vector<2x128xf32>
    %cst_153 = arith.constant dense<0.000000e+00> : vector<2x128xf32>
    %501 = tpu.matmul %493, %291, %cst_153 {dimension_numbers = #tpu.dot_dimension_numbers<[1], [0], [0], [1], [0, 0, 1, 1], [], []>} : vector<2x32xf32>, vector<32x128xf32>, vector<2x128xf32> -> vector<2x128xf32>
    %502 = arith.addf %500, %501 : vector<2x128xf32>
    %503 = vector.extract_strided_slice %502 {offsets = [0, 0], sizes = [2, 32], strides = [1, 1]} : vector<2x128xf32> to vector<2x32xf32>
    %504 = arith.negf %503 : vector<2x32xf32>
    %505 = math.exp %504 : vector<2x32xf32>
    %cst_154 = arith.constant 1.000000e+00 : f32
    %506 = vector.broadcast %cst_154 : f32 to vector<2x32xf32>
    %507 = arith.addf %506, %505 : vector<2x32xf32>
    %508 = arith.divf %506, %507 : vector<2x32xf32>
    %509 = vector.extract_strided_slice %502 {offsets = [0, 32], sizes = [2, 32], strides = [1, 1]} : vector<2x128xf32> to vector<2x32xf32>
    %510 = arith.negf %509 : vector<2x32xf32>
    %511 = math.exp %510 : vector<2x32xf32>
    %cst_155 = arith.constant 1.000000e+00 : f32
    %512 = vector.broadcast %cst_155 : f32 to vector<2x32xf32>
    %513 = arith.addf %512, %511 : vector<2x32xf32>
    %514 = arith.divf %512, %513 : vector<2x32xf32>
    %515 = vector.extract_strided_slice %502 {offsets = [0, 64], sizes = [2, 32], strides = [1, 1]} : vector<2x128xf32> to vector<2x32xf32>
    %516 = math.tanh %515 : vector<2x32xf32>
    %517 = vector.extract_strided_slice %502 {offsets = [0, 96], sizes = [2, 32], strides = [1, 1]} : vector<2x128xf32> to vector<2x32xf32>
    %518 = arith.negf %517 : vector<2x32xf32>
    %519 = math.exp %518 : vector<2x32xf32>
    %cst_156 = arith.constant 1.000000e+00 : f32
    %520 = vector.broadcast %cst_156 : f32 to vector<2x32xf32>
    %521 = arith.addf %520, %519 : vector<2x32xf32>
    %522 = arith.divf %520, %521 : vector<2x32xf32>
    %523 = arith.mulf %514, %491 : vector<2x32xf32>
    %524 = arith.mulf %508, %516 : vector<2x32xf32>
    %525 = arith.addf %523, %524 : vector<2x32xf32>
    %526 = math.tanh %525 : vector<2x32xf32>
    %527 = arith.mulf %522, %526 : vector<2x32xf32>
    %528 = arith.index_cast %c6_i32_150 : i32 to index
    %c0_157 = arith.constant 0 : index
    %c0_158 = arith.constant 0 : index
    %529 = vector.load %arg18[%528, %c0_157, %c0_158] : memref<8x2x32xf32, #tpu.memory_space<vmem>>, vector<1x2x32xf32>
    %530 = vector.shape_cast %529 : vector<1x2x32xf32> to vector<2x32xf32>
    %531 = vector.shape_cast %527 : vector<2x32xf32> to vector<1x2x32xf32>
    tpu.vector_store %arg18[%528, %c0_157, %c0_158], %531 {strides = array<i32>} : memref<8x2x32xf32, #tpu.memory_space<vmem>>, vector<1x2x32xf32>,
    %c7_i32_159 = arith.constant 7 : i32
    %532 = arith.index_cast %c7_i32_159 : i32 to index
    %c0_160 = arith.constant 0 : index
    %c0_161 = arith.constant 0 : index
    %533 = vector.load %arg19[%532, %c0_160, %c0_161] : memref<8x2x128xf32, #tpu.memory_space<vmem>>, vector<1x2x128xf32>
    %534 = vector.shape_cast %533 : vector<1x2x128xf32> to vector<2x128xf32>
    %cst_162 = arith.constant dense<0.000000e+00> : vector<2x128xf32>
    %535 = tpu.matmul %527, %291, %cst_162 {dimension_numbers = #tpu.dot_dimension_numbers<[1], [0], [0], [1], [0, 0, 1, 1], [], []>} : vector<2x32xf32>, vector<32x128xf32>, vector<2x128xf32> -> vector<2x128xf32>
    %536 = arith.addf %534, %535 : vector<2x128xf32>
    %537 = vector.extract_strided_slice %536 {offsets = [0, 0], sizes = [2, 32], strides = [1, 1]} : vector<2x128xf32> to vector<2x32xf32>
    %538 = arith.negf %537 : vector<2x32xf32>
    %539 = math.exp %538 : vector<2x32xf32>
    %cst_163 = arith.constant 1.000000e+00 : f32
    %540 = vector.broadcast %cst_163 : f32 to vector<2x32xf32>
    %541 = arith.addf %540, %539 : vector<2x32xf32>
    %542 = arith.divf %540, %541 : vector<2x32xf32>
    %543 = vector.extract_strided_slice %536 {offsets = [0, 32], sizes = [2, 32], strides = [1, 1]} : vector<2x128xf32> to vector<2x32xf32>
    %544 = arith.negf %543 : vector<2x32xf32>
    %545 = math.exp %544 : vector<2x32xf32>
    %cst_164 = arith.constant 1.000000e+00 : f32
    %546 = vector.broadcast %cst_164 : f32 to vector<2x32xf32>
    %547 = arith.addf %546, %545 : vector<2x32xf32>
    %548 = arith.divf %546, %547 : vector<2x32xf32>
    %549 = vector.extract_strided_slice %536 {offsets = [0, 64], sizes = [2, 32], strides = [1, 1]} : vector<2x128xf32> to vector<2x32xf32>
    %550 = math.tanh %549 : vector<2x32xf32>
    %551 = vector.extract_strided_slice %536 {offsets = [0, 96], sizes = [2, 32], strides = [1, 1]} : vector<2x128xf32> to vector<2x32xf32>
    %552 = arith.negf %551 : vector<2x32xf32>
    %553 = math.exp %552 : vector<2x32xf32>
    %cst_165 = arith.constant 1.000000e+00 : f32
    %554 = vector.broadcast %cst_165 : f32 to vector<2x32xf32>
    %555 = arith.addf %554, %553 : vector<2x32xf32>
    %556 = arith.divf %554, %555 : vector<2x32xf32>
    %557 = arith.mulf %548, %525 : vector<2x32xf32>
    %558 = arith.mulf %542, %550 : vector<2x32xf32>
    %559 = arith.addf %557, %558 : vector<2x32xf32>
    %560 = math.tanh %559 : vector<2x32xf32>
    %561 = arith.mulf %556, %560 : vector<2x32xf32>
    %562 = arith.index_cast %c7_i32_159 : i32 to index
    %c0_166 = arith.constant 0 : index
    %c0_167 = arith.constant 0 : index
    %563 = vector.load %arg18[%562, %c0_166, %c0_167] : memref<8x2x32xf32, #tpu.memory_space<vmem>>, vector<1x2x32xf32>
    %564 = vector.shape_cast %563 : vector<1x2x32xf32> to vector<2x32xf32>
    %565 = vector.shape_cast %561 : vector<2x32xf32> to vector<1x2x32xf32>
    tpu.vector_store %arg18[%562, %c0_166, %c0_167], %565 {strides = array<i32>} : memref<8x2x32xf32, #tpu.memory_space<vmem>>, vector<1x2x32xf32>,
    %c8_i32_168 = arith.constant 8 : i32
    %c0_169 = arith.constant 0 : index
    %c0_170 = arith.constant 0 : index
    %c0_171 = arith.constant 0 : index
    %566 = vector.load %arg18[%c0_169, %c0_170, %c0_171] : memref<8x2x32xf32, #tpu.memory_space<vmem>>, vector<8x2x32xf32>
    %c0_172 = arith.constant 0 : index
    %c0_173 = arith.constant 0 : index
    %567 = vector.load %arg12[%c0_172, %c0_173] : memref<32x16xf32, #tpu.memory_space<vmem>>, vector<32x16xf32>
    "tpu.trace_start"() <{level = 10 : i32, message = "tbh,hd->tbd"}> : () -> ()
    %cst_174 = arith.constant dense<0.000000e+00> : vector<8x2x16xf32>
    %568 = tpu.matmul %566, %567, %cst_174 {dimension_numbers = #tpu.dot_dimension_numbers<[2], [0], [0, 1], [1], [0, 0, 0, 1, 1, 1], [], []>} : vector<8x2x32xf32>, vector<32x16xf32>, vector<8x2x16xf32> -> vector<8x2x16xf32>
    "tpu.trace_stop"() : () -> ()
    %c0_175 = arith.constant 0 : index
    %c0_176 = arith.constant 0 : index
    %569 = vector.load %arg13[%c0_175, %c0_176] : memref<1x16xf32, #tpu.memory_space<vmem>>, vector<1x16xf32>
    %570 = vector.shape_cast %569 : vector<1x16xf32> to vector<1x1x16xf32>
    %571 = vector.broadcast %570 : vector<1x1x16xf32> to vector<8x2x16xf32>
    %572 = arith.addf %568, %571 : vector<8x2x16xf32>
    %573 = math.tanh %572 : vector<8x2x16xf32>
    %c0_177 = arith.constant 0 : index
    %c0_178 = arith.constant 0 : index
    %574 = vector.load %arg14[%c0_177, %c0_178] : memref<16x4xf32, #tpu.memory_space<vmem>>, vector<16x4xf32>
    "tpu.trace_start"() <{level = 10 : i32, message = "tbd,dr->tbr"}> : () -> ()
    %cst_179 = arith.constant dense<0.000000e+00> : vector<8x2x4xf32>
    %575 = tpu.matmul %573, %574, %cst_179 {dimension_numbers = #tpu.dot_dimension_numbers<[2], [0], [0, 1], [1], [0, 0, 0, 1, 1, 1], [], []>} : vector<8x2x16xf32>, vector<16x4xf32>, vector<8x2x4xf32> -> vector<8x2x4xf32>
    "tpu.trace_stop"() : () -> ()
    %c0_180 = arith.constant 0 : index
    %c0_181 = arith.constant 0 : index
    %576 = vector.load %arg15[%c0_180, %c0_181] : memref<1x4xf32, #tpu.memory_space<vmem>>, vector<1x4xf32>
    %577 = vector.shape_cast %576 : vector<1x4xf32> to vector<1x1x4xf32>
    %578 = vector.broadcast %577 : vector<1x1x4xf32> to vector<8x2x4xf32>
    %579 = arith.addf %575, %578 : vector<8x2x4xf32>
    %cst_182 = arith.constant dense<0xFF800000> : vector<2x4xf32>
    %580 = vector.multi_reduction <maximumf>, %579, %cst_182 [0] : vector<8x2x4xf32> to vector<2x4xf32>
    %581 = vector.shape_cast %580 : vector<2x4xf32> to vector<1x2x4xf32>
    %582 = vector.broadcast %581 : vector<1x2x4xf32> to vector<8x2x4xf32>
    %583 = arith.subf %579, %582 : vector<8x2x4xf32>
    %584 = math.exp %583 : vector<8x2x4xf32>
    %cst_183 = arith.constant dense<0.000000e+00> : vector<2x4xf32>
    %585 = vector.multi_reduction <add>, %584, %cst_183 [0] : vector<8x2x4xf32> to vector<2x4xf32>
    %586 = vector.shape_cast %585 : vector<2x4xf32> to vector<1x2x4xf32>
    %587 = tpu.reciprocal %586 {approx = true} : vector<1x2x4xf32> -> vector<1x2x4xf32>
    %588 = vector.broadcast %587 : vector<1x2x4xf32> to vector<8x2x4xf32>
    %589 = arith.mulf %584, %588 : vector<8x2x4xf32>
    %cst_184 = arith.constant dense<0.000000e+00> : vector<8x2xf32>
    %590 = vector.multi_reduction <add>, %589, %cst_184 [2] : vector<8x2x4xf32> to vector<8x2xf32>
    %591 = vector.shape_cast %590 : vector<8x2xf32> to vector<8x2x1xf32>
    %cst_185 = arith.constant 4.000000e+00 : f32
    %592 = vector.broadcast %cst_185 : f32 to vector<8x2x1xf32>
    %593 = arith.divf %591, %592 : vector<8x2x1xf32>
    %594 = vector.broadcast %593 : vector<8x2x1xf32> to vector<8x2x32xf32>
    %595 = arith.mulf %594, %566 : vector<8x2x32xf32>
    %cst_186 = arith.constant dense<0.000000e+00> : vector<2x32xf32>
    %596 = vector.multi_reduction <add>, %595, %cst_186 [0] : vector<8x2x32xf32> to vector<2x32xf32>
    %c0_187 = arith.constant 0 : index
    %c0_188 = arith.constant 0 : index
    %597 = vector.load %arg16[%c0_187, %c0_188] : memref<2x32xf32, #tpu.memory_space<vmem>>, vector<2x32xf32>
    tpu.vector_store %arg16[%c0_187, %c0_188], %596 {strides = array<i32>} : memref<2x32xf32, #tpu.memory_space<vmem>>, vector<2x32xf32>,
    return
  }
  func.func @transform_0(%arg0: i32) -> (i32, i32, i32) {
    %c0_i32 = arith.constant 0 : i32
    %c0_i32_0 = arith.constant 0 : i32
    %c0_i32_1 = arith.constant 0 : i32
    return %c0_i32, %arg0, %c0_i32_0 : i32, i32, i32
  }
  func.func @transform_1(%arg0: i32) -> (i32, i32) {
    %c0_i32 = arith.constant 0 : i32
    %c0_i32_0 = arith.constant 0 : i32
    %c0_i32_1 = arith.constant 0 : i32
    return %c0_i32, %c0_i32_0 : i32, i32
  }
  func.func @transform_2(%arg0: i32) -> (i32, i32) {
    %c0_i32 = arith.constant 0 : i32
    %c0_i32_0 = arith.constant 0 : i32
    %c0_i32_1 = arith.constant 0 : i32
    return %c0_i32, %c0_i32_0 : i32, i32
  }
  func.func @transform_3(%arg0: i32) -> (i32, i32) {
    %c0_i32 = arith.constant 0 : i32
    %c0_i32_0 = arith.constant 0 : i32
    %c0_i32_1 = arith.constant 0 : i32
    return %c0_i32, %c0_i32_0 : i32, i32
  }
  func.func @transform_4(%arg0: i32) -> (i32, i32) {
    %c0_i32 = arith.constant 0 : i32
    %c0_i32_0 = arith.constant 0 : i32
    return %arg0, %c0_i32 : i32, i32
  }
  func.func @transform_5(%arg0: i32) -> (i32, i32) {
    %c0_i32 = arith.constant 0 : i32
    %c0_i32_0 = arith.constant 0 : i32
    return %arg0, %c0_i32 : i32, i32
  }
  func.func @transform_6(%arg0: i32) -> (i32, i32) {
    %c0_i32 = arith.constant 0 : i32
    %c0_i32_0 = arith.constant 0 : i32
    %c0_i32_1 = arith.constant 0 : i32
    return %c0_i32, %c0_i32_0 : i32, i32
  }
  func.func @transform_7(%arg0: i32) -> (i32, i32) {
    %c0_i32 = arith.constant 0 : i32
    %c0_i32_0 = arith.constant 0 : i32
    %c0_i32_1 = arith.constant 0 : i32
    return %c0_i32, %c0_i32_0 : i32, i32
  }
  func.func @transform_8(%arg0: i32) -> (i32, i32) {
    %c0_i32 = arith.constant 0 : i32
    %c0_i32_0 = arith.constant 0 : i32
    %c0_i32_1 = arith.constant 0 : i32
    return %c0_i32, %c0_i32_0 : i32, i32
  }
  func.func @transform_9(%arg0: i32) -> (i32, i32) {
    %c0_i32 = arith.constant 0 : i32
    %c0_i32_0 = arith.constant 0 : i32
    return %arg0, %c0_i32 : i32, i32
  }
  func.func @transform_10(%arg0: i32) -> (i32, i32) {
    %c0_i32 = arith.constant 0 : i32
    %c0_i32_0 = arith.constant 0 : i32
    return %arg0, %c0_i32 : i32, i32
  }
  func.func @transform_11(%arg0: i32) -> (i32, i32) {
    %c0_i32 = arith.constant 0 : i32
    %c0_i32_0 = arith.constant 0 : i32
    %c0_i32_1 = arith.constant 0 : i32
    return %c0_i32, %c0_i32_0 : i32, i32
  }
  func.func @transform_12(%arg0: i32) -> (i32, i32) {
    %c0_i32 = arith.constant 0 : i32
    %c0_i32_0 = arith.constant 0 : i32
    %c0_i32_1 = arith.constant 0 : i32
    return %c0_i32, %c0_i32_0 : i32, i32
  }
  func.func @transform_13(%arg0: i32) -> (i32, i32) {
    %c0_i32 = arith.constant 0 : i32
    %c0_i32_0 = arith.constant 0 : i32
    %c0_i32_1 = arith.constant 0 : i32
    return %c0_i32, %c0_i32_0 : i32, i32
  }
  func.func @transform_14(%arg0: i32) -> (i32, i32) {
    %c0_i32 = arith.constant 0 : i32
    %c0_i32_0 = arith.constant 0 : i32
    %c0_i32_1 = arith.constant 0 : i32
    return %c0_i32, %c0_i32_0 : i32, i32
  }
  func.func @transform_15(%arg0: i32) -> (i32, i32) {
    %c0_i32 = arith.constant 0 : i32
    %c0_i32_0 = arith.constant 0 : i32
    return %arg0, %c0_i32 : i32, i32
  }
}

</mosaic_0001>

<bundles_post_ra>
// kernel: tpu_custom_call.1
= control target key start
LH: loop header
LB: loop body
LE: loop exit
PB: predicated region body
PF: predicated region fallthrough
CT: control target
= control target key end

     0   :  { %20 = vsyncpa [#allocation6], 0  ;;  %s4097_s0 = inlined_call_operand.hbm [shape: f32[8,2,32], index: 0, kind: input, shape index: {}]   ;;  %s4098_s1 = inlined_call_operand.vmem [shape: f32[32,128], index: 1, kind: input, shape index: {}]   ;;  %s4099_s2 = inlined_call_operand.vmem [shape: f32[32,128], index: 2, kind: input, shape index: {}]   ;;  %s4100_s3 = inlined_call_operand.hbm [shape: f32[1,128], index: 3, kind: input, shape index: {}]   ;;  %s4101_s4 = inlined_call_operand.vmem [shape: f32[2,32], index: 4, kind: input, shape index: {}]   ;;  %s4102_s5 = inlined_call_operand.hbm [shape: f32[2,32], index: 5, kind: input, shape index: {}]   ;;  %s4103_s6 = inlined_call_operand.hbm [shape: f32[32,128], index: 6, kind: input, shape index: {}]   ;;  %s4104_s7 = inlined_call_operand.hbm [shape: f32[32,128], index: 7, kind: input, shape index: {}]   ;;  %s4105_s8 = inlined_call_operand.vmem [shape: f32[1,128], index: 8, kind: input, shape index: {}]   ;;  %s4106_s9 = inlined_call_operand.vmem [shape: f32[2,32], index: 9, kind: input, shape index: {}]   ;;  %s4107_s10 = inlined_call_operand.vmem [shape: f32[2,32], index: 10, kind: input, shape index: {}]   ;;  %s4108_s11 = inlined_call_operand.vmem [shape: f32[32,16], index: 11, kind: input, shape index: {}]   ;;  %s4109_s12 = inlined_call_operand.vmem [shape: f32[1,16], index: 12, kind: input, shape index: {}]   ;;  %s4110_s13 = inlined_call_operand.vmem [shape: f32[16,4], index: 13, kind: input, shape index: {}]   ;;  %s4111_s14 = inlined_call_operand.vmem [shape: f32[1,4], index: 14, kind: input, shape index: {}]   ;;  %s4112_s15 = inlined_call_operand.hbm [shape: f32[2,32], index: 15, kind: output, shape index: {}]  }
   0x1   :  { %21 = vsyncpa [#allocation9], 0 }
   0x2   :  { %22 = vsyncpa [#allocation12], 0 }
   0x3   :  { %23 = vsyncpa [#allocation7], 0  ;;  %s3544_s18 = smov [#allocation8]   ;;  %s3545_s20 = smov [#allocation11]  }
   0x4   :  { %s46_s19 = sshll.u32 %s3544_s18, 4  ;;  %s67_s21 = sshll.u32 %s3545_s20, 4  ;;  %s47_s19 = int_to_ptr.vmem [resolvable:$true] %s46_s19  ;;  %s3639_s21 = int_to_ptr.vmem [resolvable:$true] %s67_s21 }
   0x5   :  { %s3404_s24 = scalar_lea.hbm %s4100_s3, 16 }
   0x6   :  { %p3405_p0 = scmp.ne.s32.totalorder %s4100_s3, %s3404_s24  ;;  %p3408_p1 = scmp.lt.u32.totalorder %s3404_s24, %s4100_s3 }
   0x8   :  { %p3410_p2 = pnand %p3408_p1, %p3405_p0 }
   0xa   :  { %3413 = shalt.err (!%p3410_p2)
}
   0xb   :  { %s3414_s29 = scalar_lea.vmem %s47_s19, 16  ;;  %s3418_s30 = scalar_lea.vmem %s47_s19, 32 }
   0xc   :  { %p3415_p3 = scmp.ne.s32.totalorder %s47_s19, %s3414_s29  ;;  %p3419_p4 = scmp.lt.s32.totalorder %s47_s19, %s47_s19 }
   0xd   :  { %p3420_p5 = scmp.lt.s32.totalorder %s3418_s30, %s3414_s29 }
   0xf   :  { %p3421_p6 = por %p3420_p5, %p3419_p4 }
  0x11   :  { %p3422_p7 = pnand %p3421_p6, %p3415_p3 }
  0x13   :  { %3425 = shalt.err (!%p3422_p7)
}
  0x14   :  { %49 = dma.hbm_to_vmem [thread:$0]  %s4100_s3, 16, %s47_s19, [#allocation9]  }
  0x15   :  { %s3426_s22 = scalar_lea.hbm %s4103_s6, 512 }
  0x16   :  { %p3427_p8 = scmp.ne.s32.totalorder %s4103_s6, %s3426_s22  ;;  %p3430_p9 = scmp.lt.u32.totalorder %s3426_s22, %s4103_s6 }
  0x18   :  { %p3432_p10 = pnand %p3430_p9, %p3427_p8 }
  0x1a   :  { %3435 = shalt.err (!%p3432_p10)
}
  0x1b   :  { %s3436_s27 = scalar_lea.vmem %s3639_s21, 512  ;;  %p3441_p12 = scmp.lt.s32.totalorder %s3639_s21, %s3639_s21 }
  0x1c   :  { %p3437_p11 = scmp.ne.s32.totalorder %s3639_s21, %s3436_s27  ;;  %p3442_p13 = scmp.lt.s32.totalorder %s3436_s27, %s3436_s27 }
  0x1e   :  { %p3443_p0 = por %p3442_p13, %p3441_p12 }
  0x20   :  { %p3444_p1 = pnand %p3443_p0, %p3437_p11 }
  0x22   :  { %3447 = shalt.err (!%p3444_p1)
}
  0x23   :  { %s4113_s3 = smov 128   ;;  %s3547_s19 = smov 8  }
  0x24   :  { %73 = dma.hbm_to_vmem [thread:$0]  %s4103_s6, 512, %s3639_s21, [#allocation12], %s4113_s3, %s4113_s3, %s3547_s19  }
  0x25   :  { %s3548_s30 = smov [#allocation5]   ;;  %s3448_s20 = scalar_lea.hbm %s4097_s0, 256 }
  0x26   :  { %s29_s16 = sshll.u32 %s3548_s30, 4  ;;  %p3449_p2 = scmp.ne.s32.totalorder %s4097_s0, %s3448_s20  ;;  %s30_s16 = int_to_ptr.vmem [resolvable:$true] %s29_s16 }
  0x27   :  { %p3452_p3 = scmp.lt.u32.totalorder %s3448_s20, %s4097_s0 }
  0x29   :  { %p3454_p4 = pnand %p3452_p3, %p3449_p2 }
  0x2b   :  { %3457 = shalt.err (!%p3454_p4)
}
  0x2c   :  { %s3458_s26 = scalar_lea.vmem %s30_s16, 256  ;;  %p3463_p6 = scmp.lt.s32.totalorder %s30_s16, %s30_s16 }
  0x2d   :  { %p3459_p5 = scmp.ne.s32.totalorder %s30_s16, %s3458_s26  ;;  %p3464_p7 = scmp.lt.s32.totalorder %s3458_s26, %s3458_s26 }
  0x2f   :  { %p3465_p8 = por %p3464_p7, %p3463_p6 }
  0x31   :  { %p3466_p9 = pnand %p3465_p8, %p3459_p5 }
  0x33   :  { %3469 = shalt.err (!%p3466_p9)
}
  0x34   :  { %s3549_s6 = smov 32   ;;  %s3550_s21 = smov 2  }
  0x35   :  { %35 = dma.hbm_to_vmem [thread:$0]  %s4097_s0, 256, %s30_s16, [#allocation6], %s3549_s6, %s3549_s6, %s3550_s21  }
  0x36   :  { %s3551_s29 = smov [#allocation10]   ;;  %s3552_s17 = smov [#allocation13]  }
  0x37   :  { %s58_s30 = sshll.u32 %s3551_s29, 4  ;;  %s79_s18 = sshll.u32 %s3552_s17, 4  ;;  %s59_s30 = int_to_ptr.vmem [resolvable:$true] %s58_s30  ;;  %s80_s18 = int_to_ptr.vmem [resolvable:$true] %s79_s18 }
  0x38   :  { %s3470_s23 = scalar_lea.hbm %s4102_s5, 32 }
  0x39   :  { %p3471_p10 = scmp.ne.s32.totalorder %s4102_s5, %s3470_s23  ;;  %p3474_p11 = scmp.lt.u32.totalorder %s3470_s23, %s4102_s5 }
  0x3b   :  { %p3476_p12 = pnand %p3474_p11, %p3471_p10 }
  0x3d   :  { %3479 = shalt.err (!%p3476_p12)
}
  0x3e   :  { %s3480_s0 = scalar_lea.vmem %s59_s30, 32  ;;  %p3485_p0 = scmp.lt.s32.totalorder %s59_s30, %s59_s30 }
  0x3f   :  { %p3481_p13 = scmp.ne.s32.totalorder %s59_s30, %s3480_s0  ;;  %p3486_p1 = scmp.lt.s32.totalorder %s3480_s0, %s3480_s0 }
  0x41   :  { %p3487_p2 = por %p3486_p1, %p3485_p0 }
  0x43   :  { %p3488_p3 = pnand %p3487_p2, %p3481_p13 }
  0x45   :  { %3491 = shalt.err (!%p3488_p3)
}
  0x46   :  { %61 = dma.hbm_to_vmem [thread:$0]  %s4102_s5, 32, %s59_s30, [#allocation9]  }
  0x47   :  { %s3492_s29 = scalar_lea.hbm %s4104_s7, 512 }
  0x48   :  { %p3493_p4 = scmp.ne.s32.totalorder %s4104_s7, %s3492_s29  ;;  %p3496_p5 = scmp.lt.u32.totalorder %s3492_s29, %s4104_s7 }
  0x4a   :  { %p3498_p6 = pnand %p3496_p5, %p3493_p4 }
  0x4c   :  { %3501 = shalt.err (!%p3498_p6)
}
  0x4d   :  { %s3502_s23 = scalar_lea.vmem %s80_s18, 512  ;;  %p3507_p8 = scmp.lt.s32.totalorder %s80_s18, %s80_s18 }
  0x4e   :  { %p3503_p7 = scmp.ne.s32.totalorder %s80_s18, %s3502_s23  ;;  %p3508_p9 = scmp.lt.s32.totalorder %s3502_s23, %s3502_s23 }
  0x50   :  { %p3509_p10 = por %p3508_p9, %p3507_p8 }
  0x52   :  { %p3510_p11 = pnand %p3509_p10, %p3503_p7 }
  0x54   :  { %3513 = shalt.err (!%p3510_p11)
}
  0x55   :  { %s4114_s5 = smov 128  }
  0x56   :  { %85 = dma.hbm_to_vmem [thread:$0]  %s4104_s7, 512, %s80_s18, [#allocation12], %s4114_s5, %s4114_s5, %s3547_s19  }
  0x57   :  { %3536 = dma.done.wait [#allocation6], 256  }
  0x58   :  { %3537 = vsyncadd [#allocation6], 4294967040 }
  0x59   :  { %3538 = dma.done.wait [#allocation9], 48  }
  0x5a   :  { %3539 = vsyncadd [#allocation9], 4294967248 }
  0x5b   :  { %3540 = dma.done.wait [#allocation12], 1024  }
  0x5c   :  { %3541 = vsyncadd [#allocation12], 4294966272  ;;  %v146_v0 = vlaneseq  ;;  %v3553_v1 = vmov 1983009808   ;;  %v3554_v3 = vmov 0.0|0.0   ;;  %vm3555_vm0 = vmmov 0  }
  0x5d   :  { %v144_v2 = vunpack.c.l.s4 %v3553_v1  ;;  %3111 = vmatprep.subr.bf16.mxu1 %v3554_v3  ;;  %v3556_v4 = vmov 0.0   ;;  %v123_v7 = vld [vmem:[%s4098_s1] sm:$0xff]  ;;  %v124_v8 = vld [vmem:[%s4098_s1 + $0x8] sm:$0xff]  ;;  %v125_v9 = vld [vmem:[%s4098_s1 + $0x10] sm:$0xff]  ;;  %vm185_vm1 = vcmask 261120   ;;  %vm430_vm2 = vcmask 254976  }
  0x5e   :  { %2906 = vmatprep.mubr.msk.f32.mxu1 %vm3555_vm0, %v3556_v4  ;;  %v147_v6 = vshrl.u32 %v146_v0, 7  ;;  %v3103_v11 = vpack.c.bf16 %v124_v8, %v123_v7  ;;  %v126_v12 = vld [vmem:[%s4098_s1 + $0x18] sm:$0xff]  ;;  %v115_v13 = vld [vmem:[#allocation5] sm:$0x3]  ;;  %v116_v14 = vld [vmem:[#allocation5 + $0x2] sm:$0x3] }
  0x5f   :  { %v145_v5 = vunpack.c.0.s8 %v144_v2  ;;  %v3107_v15 = vpack.c.bf16 %v126_v12, %v125_v9  ;;  %v117_v16 = vld [vmem:[#allocation5 + $0x4] sm:$0x3]  ;;  %v118_v17 = vld [vmem:[#allocation5 + $0x6] sm:$0x3]  ;;  %v141_v18 = vcombine.low %v115_v13, %v116_v14  ;;  %v119_v19 = vld [vmem:[#allocation5 + $0x8] sm:$0x3] }
  0x60   :  { %3104 = vmatprep.subr.bf16.mxu0 %v3103_v11  ;;  %v142_v20 = vcombine.low %v117_v16, %v118_v17  ;;  %v120_v21 = vld [vmem:[#allocation5 + $0xa] sm:$0x3]  ;;  %v121_v22 = vld [vmem:[#allocation5 + $0xc] sm:$0x3]  ;;  %v122_v23 = vld [vmem:[#allocation5 + $0xe] sm:$0x3] }
  0x61   :  { %v3726_v10 = vsub.s32 %v145_v5, %v147_v6  ;;  %3106 = vmatpush3.bf16.msra.mxu0 %v3103_v11  ;;  %v158_v25 = vcombine.low %v119_v19, %v120_v21  ;;  %v159_v26 = vcombine.low %v121_v22, %v122_v23  ;;  %v317_v27 = vld [vmem:[%s4099_s2] sm:$0xff]  ;;  %v318_v28 = vld [vmem:[%s4099_s2 + $0x8] sm:$0xff]  ;;  %v319_v29 = vld [vmem:[%s4099_s2 + $0x10] sm:$0xff]  ;;  %vm2471_vm3 = vcmask 130048  }
  0x62   :  { %3108 = vmatprep.subr.bf16.mxu0 %v3107_v15  ;;  %v3742_v31 = vpack.c.bf16 %v318_v28, %v317_v27  ;;  %v320_v32 = vld [vmem:[%s4099_s2 + $0x18] sm:$0xff]  ;;  %v321_v38 = vld [vmem:[%s4101_s4] sm:$0x3]  ;;  %s3557_s4 = smov 64   ;;  %v322_v62 = vld [vmem:[#allocation10] sm:$0x3] }
  0x63   :  { %v149_v24 = vrot.slane %v141_v18, %v3726_v10  ;;  %v156_v30 = vrot.slane %v142_v20, %v3726_v10  ;;  %v166_v33 = vrot.slane %v158_v25, %v3726_v10  ;;  %v173_v34 = vrot.slane %v159_v26, %v3726_v10  ;;  %v2733_v39 = vld [vmem:[#allocation8] ss:$0 sm:$0xff] }
  0x64   :  { %3113 = vmatpush3.bf16.msra.mxu1 %v3742_v31  ;;  %v3750_v36 = vpack.c.bf16 %v320_v32, %v319_v29  ;;  %v175_v40 = vcombine.low %v2733_v39, %v2733_v39  ;;  %vm2595_vm4 = vcmask 25600  }
  0x65   :  { %v157_v35 = vcombine.low %v149_v24, %v156_v30  ;;  %3110 = vmatpush3.bf16.msra.mxu0 %v3107_v15  ;;  %v174_v37 = vcombine.low %v166_v33, %v173_v34  ;;  %3114 = vmatprep.subr.bf16.mxu1 %v3554_v3 }
  0x66   :  { %3117 = vmatprep.subr.bf16.mxu0 %v3554_v3  ;;  %v182_v41 = vrot.slane %v175_v40, %v3726_v10 }
  0x67   :  { %2895 = vmatprep.mubr.msk.f32.mxu0 %vm185_vm1, %v157_v35 }
  0x68   :  { %2896 = vmatmul.mubr.msk.f32.vlgmr.msra.gmra.mrb[0].mxu0 %vm185_vm1, %v174_v37  ;;  %3116 = vmatpush3.bf16.msra.mxu1 %v3750_v36  ;;  %v183_v42 = vcombine.low %v182_v41, %v182_v41 }
  0x69   :  { %3119 = vmatpush3.bf16.msra.mxu0 %v3742_v31  ;;  %2917 = vmatprep.mubr.msk.f32.mxu0 %vm3555_vm0, %v3556_v4 }
  0x6a   :  { %3120 = vmatprep.subr.bf16.mxu0 %v3554_v3  ;;  %3123 = vmatprep.subr.bf16.mxu1 %v3554_v3 }
  0x6b   :  { %2907 = vmatmul.mubr.msk.f32.vlgmr.msra.gmra.mrb[0].mxu1 %vm185_vm1, %v321_v38 }
  0x6c   :  { %3125 = vmatpush3.bf16.msra.mxu1 %v3742_v31  ;;  %2928 = vmatprep.mubr.msk.f32.mxu1 %vm3555_vm0, %v3556_v4 }
  0x6d   :  { %3122 = vmatpush3.bf16.msra.mxu0 %v3750_v36  ;;  %3126 = vmatprep.subr.bf16.mxu1 %v3554_v3 }
  0x6e   :  { %3129 = vmatprep.subr.bf16.mxu0 %v3554_v3 }
  0x70   :  { %3128 = vmatpush3.bf16.msra.mxu1 %v3750_v36 }
  0x71   :  { %3135 = vmatprep.subr.bf16.mxu1 %v3554_v3 }
 0x13b   :  { %v2897_v43 = vpop.f32.mrb[0].mxu0 }
 0x13c   :  { %v262_v44 = vadd.f32 %v2897_v43, %v183_v42  ;;  %v256_v45 = vpop.f32.mrb[1].mxu0 }
 0x13d   :  { %v257_v46 = vadd.f32 %v256_v45, %v183_v42 }
 0x13e   :  { %v284_v47 = vcombine.high %v262_v44, %v262_v44  ;;  %v291_v48 = vrot.slane %v262_v44, %v3726_v10  ;;  %2738 = vst.sshfl [vmem:[#allocation4 + $0x8] sm:$0x3 pattern:$0x76325410] %v262_v44  ;;  %v393_v49 = vpop.f32.mrb[0].mxu1 }
 0x13f   :  { %v267_v50 = vcombine.high %v257_v46, %v257_v46  ;;  %v274_v51 = vrot.slane %v257_v46, %v3726_v10  ;;  %2736 = vst.sshfl [vmem:[#allocation4] sm:$0x3 pattern:$0x76325410] %v257_v46  ;;  %v2908_v52 = vpop.f32.mrb[1].mxu1 }
 0x140   :  { %v298_v53 = vrot.slane %v284_v47, %v3726_v10  ;;  %v299_v54 = vcombine.high %v291_v48, %v291_v48  ;;  %2739 = vst.sshfl [vmem:[#allocation4 + $0xc] sm:$0x3 pattern:$0x76325410] %v284_v47 }
 0x141   :  { %v281_v55 = vrot.slane %v267_v50, %v3726_v10  ;;  %v282_v56 = vcombine.high %v274_v51, %v274_v51  ;;  %2737 = vst.sshfl [vmem:[#allocation4 + $0x4] sm:$0x3 pattern:$0x76325410] %v267_v50 }
 0x142   :  { %v300_v57 = vcombine.high %v298_v53, %v298_v53  ;;  %314 = vst [vmem:[#allocation4 + $0xa] sm:$0x3] %v299_v54 }
 0x143   :  { %v283_v58 = vcombine.high %v281_v55, %v281_v55  ;;  %310 = vst [vmem:[#allocation4 + $0x2] sm:$0x3] %v282_v56 }
 0x144   :  { %316 = vst [vmem:[#allocation4 + $0xe] sm:$0x3] %v300_v57 }
 0x145   :  { %312 = vst [vmem:[#allocation4 + $0x6] sm:$0x3] %v283_v58 }
 0x146   :  { %v323_v59 = vld [vmem:[#allocation4] sm:$0x3] }
 0x147   :  { %v397_v60 = vadd.f32 %v393_v49, %v323_v59 }
 0x148   :  { %v538_v35 = vld [vmem:[#allocation4 + $0x4] sm:$0x3] }
 0x149   :  { %3242 = vtanh.f32 %v397_v60  ;;  %v2741_v63 = vmul.f32 -1.442695, %v397_v60 }
 0x14a   :  { %v433_v16 = vld [vmem:[#allocation4 + $0x2] sm:$0x3] }
 0x14b   :  { %3244 = vpow2.f32 %v2741_v63 }
 0x14c   :  { %v643_v54 = vld [vmem:[#allocation4 + $0x6] sm:$0x3] }
 0x153   :  { %v3243_v61 = vpop.eup %3242 }
 0x154   :  { %411 = vrot.lane.b32.xlu0 %v3243_v61, %s3557_s4 }
 0x155   :  { %v3245_v0 = vpop.eup %3244 }
 0x156   :  { %v401_v1 = vadd.f32 1.0, %v3245_v0 }
 0x158   :  { %406 = vrot.lane.b32.xlu0 %v322_v62, %s3549_s6  ;;  %3246 = vrcp.f32 %v401_v1 }
 0x162   :  { %v3247_v2 = vpop.eup %3246 }
 0x1c6   :  { %v412_v5 = vpop.permute.xlu0 %411 }
 0x1c7   :  { %v414_v6 = vmul.f32 %v3247_v2, %v412_v5 }
 0x1c9   :  { %416 = vrot.lane.b32.xlu1 %v414_v6, %s3549_s6 }
 0x1ca   :  { %v407_v7 = vpop.permute.xlu0 %406 }
 0x1cb   :  { %v409_v8 = vmul.f32 %v3247_v2, %v407_v7 }
 0x23b   :  { %v417_v9 = vpop.permute.xlu1 %416 }
 0x23c   :  { %v419_v11 = vadd.f32 %v417_v9, %v409_v8 }
 0x23e   :  { %3248 = vtanh.f32 %v419_v11 }
 0x248   :  { %v3249_v12 = vpop.eup %3248 }
 0x249   :  { %422 = vrot.lane.b32.xlu1 %v3249_v12, %s3557_s4 }
 0x2bb   :  { %v423_v13 = vpop.permute.xlu1 %422 }
 0x2bc   :  { %v425_v14 = vmul.f32 %v3247_v2, %v423_v13 }
 0x2be   :  { %427 = vrot.lane.b32.xlu0 %v425_v14, %s3549_s6 }
 0x330   :  { %v428_v15 = vpop.permute.xlu0 %427 }
 0x331   :  { %431 = vst.msk [vmem:[#allocation2] sm:$0x3] %vm430_vm2, %v428_v15  ;;  %2918 = vmatmul.mubr.msk.f32.vlgmr.msra.gmra.mrb[2].mxu0 %vm185_vm1, %v428_v15 }
 0x332   :  { %3131 = vmatpush3.bf16.msra.mxu0 %v3742_v31  ;;  %2939 = vmatprep.mubr.msk.f32.mxu0 %vm3555_vm0, %v3556_v4 }
 0x333   :  { %3132 = vmatprep.subr.bf16.mxu0 %v3554_v3 }
 0x336   :  { %3134 = vmatpush3.bf16.msra.mxu0 %v3750_v36 }
 0x337   :  { %3141 = vmatprep.subr.bf16.mxu0 %v3554_v3 }
 0x404   :  { %v502_v17 = vpop.f32.mrb[2].mxu0 }
 0x405   :  { %v506_v18 = vadd.f32 %v502_v17, %v433_v16  ;;  %v2919_v19 = vpop.f32.mrb[3].mxu0 }
 0x407   :  { %3250 = vtanh.f32 %v506_v18  ;;  %v2743_v21 = vmul.f32 -1.442695, %v506_v18 }
 0x409   :  { %3252 = vpow2.f32 %v2743_v21 }
 0x411   :  { %v3251_v20 = vpop.eup %3250 }
 0x412   :  { %516 = vrot.lane.b32.xlu1 %v3251_v20, %s3557_s4 }
 0x413   :  { %v3253_v22 = vpop.eup %3252 }
 0x414   :  { %v510_v23 = vadd.f32 1.0, %v3253_v22 }
 0x416   :  { %3254 = vrcp.f32 %v510_v23 }
 0x420   :  { %v3255_v24 = vpop.eup %3254 }
 0x421   :  { %v514_v27 = vmul.f32 %v3255_v24, %v419_v11  ;;  %v748_v11 = vld [vmem:[#allocation4 + $0x8] sm:$0x3] }
 0x484   :  { %v517_v25 = vpop.permute.xlu1 %516 }
 0x485   :  { %v519_v26 = vmul.f32 %v3255_v24, %v517_v25 }
 0x487   :  { %521 = vrot.lane.b32.xlu0 %v519_v26, %s3549_s6 }
 0x4f9   :  { %v522_v28 = vpop.permute.xlu0 %521 }
 0x4fa   :  { %v524_v29 = vadd.f32 %v522_v28, %v514_v27 }
 0x4fc   :  { %3256 = vtanh.f32 %v524_v29 }
 0x506   :  { %v3257_v30 = vpop.eup %3256 }
 0x507   :  { %527 = vrot.lane.b32.xlu1 %v3257_v30, %s3557_s4 }
 0x579   :  { %v528_v32 = vpop.permute.xlu1 %527 }
 0x57a   :  { %v530_v33 = vmul.f32 %v3255_v24, %v528_v32 }
 0x57c   :  { %532 = vrot.lane.b32.xlu0 %v530_v33, %s3549_s6 }
 0x5ee   :  { %v533_v34 = vpop.permute.xlu0 %532 }
 0x5ef   :  { %536 = vst.msk [vmem:[#allocation2 + $0x2] sm:$0x3] %vm430_vm2, %v533_v34  ;;  %2929 = vmatmul.mubr.msk.f32.vlgmr.msra.gmra.mrb[2].mxu1 %vm185_vm1, %v533_v34 }
 0x5f0   :  { %3137 = vmatpush3.bf16.msra.mxu1 %v3742_v31  ;;  %2950 = vmatprep.mubr.msk.f32.mxu1 %vm3555_vm0, %v3556_v4 }
 0x5f1   :  { %3138 = vmatprep.subr.bf16.mxu1 %v3554_v3 }
 0x5f4   :  { %3140 = vmatpush3.bf16.msra.mxu1 %v3750_v36 }
 0x5f5   :  { %3147 = vmatprep.subr.bf16.mxu1 %v3554_v3 }
 0x6c2   :  { %v607_v37 = vpop.f32.mrb[2].mxu1 }
 0x6c3   :  { %v611_v38 = vadd.f32 %v607_v37, %v538_v35  ;;  %v2930_v39 = vpop.f32.mrb[3].mxu1 }
 0x6c5   :  { %3258 = vtanh.f32 %v611_v38  ;;  %v2745_v41 = vmul.f32 -1.442695, %v611_v38 }
 0x6c7   :  { %3260 = vpow2.f32 %v2745_v41 }
 0x6cf   :  { %v3259_v40 = vpop.eup %3258 }
 0x6d0   :  { %621 = vrot.lane.b32.xlu1 %v3259_v40, %s3557_s4 }
 0x6d1   :  { %v3261_v42 = vpop.eup %3260 }
 0x6d2   :  { %v615_v43 = vadd.f32 1.0, %v3261_v42 }
 0x6d4   :  { %3262 = vrcp.f32 %v615_v43 }
 0x6de   :  { %v3263_v44 = vpop.eup %3262 }
 0x6df   :  { %v619_v47 = vmul.f32 %v3263_v44, %v524_v29  ;;  %v853_v29 = vld [vmem:[#allocation4 + $0xa] sm:$0x3] }
 0x742   :  { %v622_v45 = vpop.permute.xlu1 %621 }
 0x743   :  { %v624_v46 = vmul.f32 %v3263_v44, %v622_v45 }
 0x745   :  { %626 = vrot.lane.b32.xlu0 %v624_v46, %s3549_s6 }
 0x7b7   :  { %v627_v48 = vpop.permute.xlu0 %626 }
 0x7b8   :  { %v629_v49 = vadd.f32 %v627_v48, %v619_v47  ;;  %v1168_v47 = vld [vmem:[#allocation2 + $0x2] sm:$0x3] }
 0x7ba   :  { %3264 = vtanh.f32 %v629_v49 }
 0x7c4   :  { %v3265_v50 = vpop.eup %3264 }
 0x7c5   :  { %632 = vrot.lane.b32.xlu1 %v3265_v50, %s3557_s4  ;;  %v1167_v50 = vld [vmem:[#allocation2] sm:$0x3] }
 0x837   :  { %v633_v51 = vpop.permute.xlu1 %632 }
 0x838   :  { %v635_v52 = vmul.f32 %v3263_v44, %v633_v51  ;;  %v1193_v51 = vcombine.low %v1167_v50, %v1168_v47 }
 0x83a   :  { %637 = vrot.lane.b32.xlu0 %v635_v52, %s3549_s6 }
 0x8ac   :  { %v638_v53 = vpop.permute.xlu0 %637 }
 0x8ad   :  { %641 = vst.msk [vmem:[#allocation2 + $0x4] sm:$0x3] %vm430_vm2, %v638_v53  ;;  %2940 = vmatmul.mubr.msk.f32.vlgmr.msra.gmra.mrb[4].mxu0 %vm185_vm1, %v638_v53  ;;  %v1201_v53 = vrot.slane %v1193_v51, %v3726_v10 }
 0x8ae   :  { %3143 = vmatpush3.bf16.msra.mxu0 %v3742_v31  ;;  %2961 = vmatprep.mubr.msk.f32.mxu0 %vm3555_vm0, %v3556_v4 }
 0x8af   :  { %3144 = vmatprep.subr.bf16.mxu0 %v3554_v3 }
 0x8b2   :  { %3146 = vmatpush3.bf16.msra.mxu0 %v3750_v36 }
 0x8b3   :  { %3153 = vmatprep.subr.bf16.mxu0 %v3554_v3 }
 0x8b4   :  { %v1169_v48 = vld [vmem:[#allocation2 + $0x4] sm:$0x3] }
 0x980   :  { %v712_v55 = vpop.f32.mrb[4].mxu0 }
 0x981   :  { %v716_v56 = vadd.f32 %v712_v55, %v643_v54  ;;  %v2941_v57 = vpop.f32.mrb[5].mxu0 }
 0x983   :  { %3266 = vtanh.f32 %v716_v56  ;;  %v2747_v59 = vmul.f32 -1.442695, %v716_v56  ;;  %v958_v56 = vld [vmem:[#allocation4 + $0xc] sm:$0x3] }
 0x985   :  { %3268 = vpow2.f32 %v2747_v59 }
 0x98d   :  { %v3267_v58 = vpop.eup %3266 }
 0x98e   :  { %726 = vrot.lane.b32.xlu1 %v3267_v58, %s3557_s4 }
 0x98f   :  { %v3269_v60 = vpop.eup %3268 }
 0x990   :  { %v720_v61 = vadd.f32 1.0, %v3269_v60 }
 0x992   :  { %3270 = vrcp.f32 %v720_v61 }
 0x99c   :  { %v3271_v62 = vpop.eup %3270 }
 0x99d   :  { %v724_v1 = vmul.f32 %v3271_v62, %v629_v49 }
 0xa00   :  { %v727_v63 = vpop.permute.xlu1 %726 }
 0xa01   :  { %v729_v0 = vmul.f32 %v3271_v62, %v727_v63 }
 0xa03   :  { %731 = vrot.lane.b32.xlu0 %v729_v0, %s3549_s6 }
 0xa75   :  { %v732_v2 = vpop.permute.xlu0 %731 }
 0xa76   :  { %v734_v5 = vadd.f32 %v732_v2, %v724_v1 }
 0xa78   :  { %3272 = vtanh.f32 %v734_v5 }
 0xa82   :  { %v3273_v6 = vpop.eup %3272 }
 0xa83   :  { %737 = vrot.lane.b32.xlu1 %v3273_v6, %s3557_s4 }
 0xaf5   :  { %v738_v7 = vpop.permute.xlu1 %737 }
 0xaf6   :  { %v740_v8 = vmul.f32 %v3271_v62, %v738_v7 }
 0xaf8   :  { %742 = vrot.lane.b32.xlu0 %v740_v8, %s3549_s6 }
 0xb6a   :  { %v743_v9 = vpop.permute.xlu0 %742 }
 0xb6b   :  { %746 = vst.msk [vmem:[#allocation2 + $0x6] sm:$0x3] %vm430_vm2, %v743_v9  ;;  %2951 = vmatmul.mubr.msk.f32.vlgmr.msra.gmra.mrb[4].mxu1 %vm185_vm1, %v743_v9 }
 0xb6c   :  { %3149 = vmatpush3.bf16.msra.mxu1 %v3742_v31  ;;  %2972 = vmatprep.mubr.msk.f32.mxu1 %vm3555_vm0, %v3556_v4 }
 0xb6d   :  { %3150 = vmatprep.subr.bf16.mxu1 %v3554_v3 }
 0xb70   :  { %3152 = vmatpush3.bf16.msra.mxu1 %v3750_v36 }
 0xb72   :  { %v1170_v46 = vld [vmem:[#allocation2 + $0x6] sm:$0x3] }
 0xb73   :  { %v1194_v49 = vcombine.low %v1169_v48, %v1170_v46 }
 0xb75   :  { %v1208_v52 = vrot.slane %v1194_v49, %v3726_v10 }
 0xb77   :  { %v1209_v55 = vcombine.low %v1201_v53, %v1208_v52 }
 0xc3e   :  { %v817_v12 = vpop.f32.mrb[4].mxu1 }
 0xc3f   :  { %v821_v13 = vadd.f32 %v817_v12, %v748_v11  ;;  %v2952_v14 = vpop.f32.mrb[5].mxu1 }
 0xc41   :  { %3274 = vtanh.f32 %v821_v13  ;;  %v2749_v16 = vmul.f32 -1.442695, %v821_v13  ;;  %v1063_v13 = vld [vmem:[#allocation4 + $0xe] sm:$0x3] }
 0xc43   :  { %3276 = vpow2.f32 %v2749_v16 }
 0xc4b   :  { %v3275_v15 = vpop.eup %3274 }
 0xc4c   :  { %831 = vrot.lane.b32.xlu1 %v3275_v15, %s3557_s4 }
 0xc4d   :  { %v3277_v17 = vpop.eup %3276 }
 0xc4e   :  { %v825_v18 = vadd.f32 1.0, %v3277_v17 }
 0xc50   :  { %3278 = vrcp.f32 %v825_v18 }
 0xc5a   :  { %v3279_v19 = vpop.eup %3278 }
 0xc5b   :  { %v829_v22 = vmul.f32 %v3279_v19, %v734_v5 }
 0xcbe   :  { %v832_v20 = vpop.permute.xlu1 %831 }
 0xcbf   :  { %v834_v21 = vmul.f32 %v3279_v19, %v832_v20 }
 0xcc1   :  { %836 = vrot.lane.b32.xlu0 %v834_v21, %s3549_s6 }
 0xd33   :  { %v837_v23 = vpop.permute.xlu0 %836 }
 0xd34   :  { %v839_v24 = vadd.f32 %v837_v23, %v829_v22 }
 0xd36   :  { %3280 = vtanh.f32 %v839_v24 }
 0xd40   :  { %v3281_v25 = vpop.eup %3280 }
 0xd41   :  { %842 = vrot.lane.b32.xlu1 %v3281_v25, %s3557_s4 }
 0xdb3   :  { %v843_v26 = vpop.permute.xlu1 %842 }
 0xdb4   :  { %v845_v27 = vmul.f32 %v3279_v19, %v843_v26 }
 0xdb6   :  { %847 = vrot.lane.b32.xlu0 %v845_v27, %s3549_s6 }
 0xe28   :  { %v848_v28 = vpop.permute.xlu0 %847 }
 0xe29   :  { %851 = vst.msk [vmem:[#allocation2 + $0x8] sm:$0x3] %vm430_vm2, %v848_v28  ;;  %2962 = vmatmul.mubr.msk.f32.vlgmr.msra.gmra.mrb[6].mxu0 %vm185_vm1, %v848_v28  ;;  %v1175_v28 = vld [vmem:[#allocation11] sm:$0xff] }
 0xe2a   :  { %3155 = vmatpush3.bf16.msra.mxu0 %v3742_v31  ;;  %2983 = vmatprep.mubr.msk.f32.mxu0 %vm3555_vm0, %v3556_v4 }
 0xe2b   :  { %3156 = vmatprep.subr.bf16.mxu0 %v3554_v3 }
 0xe2e   :  { %3158 = vmatpush3.bf16.msra.mxu0 %v3750_v36 }
 0xe2f   :  { %3167 = vmatprep.subr.bf16.mxu0 %v3554_v3 }
 0xe30   :  { %v1171_v46 = vld [vmem:[#allocation2 + $0x8] sm:$0x3] }
 0xefc   :  { %v922_v30 = vpop.f32.mrb[6].mxu0 }
 0xefd   :  { %v926_v32 = vadd.f32 %v922_v30, %v853_v29  ;;  %v2963_v33 = vpop.f32.mrb[7].mxu0  ;;  %v1176_v29 = vld [vmem:[#allocation11 + $0x8] sm:$0xff]  ;;  %v1177_v30 = vld [vmem:[#allocation11 + $0x10] sm:$0xff] }
 0xefe   :  { %v1178_v33 = vld [vmem:[#allocation11 + $0x18] sm:$0xff] }
 0xeff   :  { %3282 = vtanh.f32 %v926_v32  ;;  %v2751_v35 = vmul.f32 -1.442695, %v926_v32  ;;  %v3159_v32 = vpack.c.bf16 %v1176_v29, %v1175_v28 }
 0xf01   :  { %3284 = vpow2.f32 %v2751_v35  ;;  %3160 = vmatprep.subr.bf16.mxu1 %v3159_v32 }
 0xf09   :  { %v3283_v34 = vpop.eup %3282 }
 0xf0a   :  { %936 = vrot.lane.b32.xlu1 %v3283_v34, %s3557_s4  ;;  %v3163_v34 = vpack.c.bf16 %v1178_v33, %v1177_v30 }
 0xf0b   :  { %v3285_v31 = vpop.eup %3284 }
 0xf0c   :  { %v930_v37 = vadd.f32 1.0, %v3285_v31 }
 0xf0e   :  { %3286 = vrcp.f32 %v930_v37  ;;  %v1368_v37 = vld [vmem:[#allocation13] sm:$0xff] }
 0xf18   :  { %v3287_v38 = vpop.eup %3286 }
 0xf19   :  { %v934_v36 = vmul.f32 %v3287_v38, %v839_v24 }
 0xf7c   :  { %v937_v39 = vpop.permute.xlu1 %936 }
 0xf7d   :  { %v939_v40 = vmul.f32 %v3287_v38, %v937_v39  ;;  %v1370_v39 = vld [vmem:[#allocation13 + $0x10] sm:$0xff] }
 0xf7f   :  { %941 = vrot.lane.b32.xlu0 %v939_v40, %s3549_s6 }
 0xff1   :  { %v942_v41 = vpop.permute.xlu0 %941 }
 0xff2   :  { %v944_v42 = vadd.f32 %v942_v41, %v934_v36  ;;  %v1371_v36 = vld [vmem:[#allocation13 + $0x18] sm:$0xff] }
 0xff3   :  { %v1373_v41 = vld [vmem:[%s4107_s10] sm:$0x3] }
 0xff4   :  { %3288 = vtanh.f32 %v944_v42 }
 0xffe   :  { %v3289_v43 = vpop.eup %3288 }
 0xfff   :  { %947 = vrot.lane.b32.xlu1 %v3289_v43, %s3557_s4  ;;  %v1372_v43 = vld [vmem:[%s4106_s9] sm:$0x3] }
0x1071   :  { %v948_v44 = vpop.permute.xlu1 %947 }
0x1072   :  { %v950_v45 = vmul.f32 %v3287_v38, %v948_v44  ;;  %v1369_v38 = vld [vmem:[#allocation13 + $0x8] sm:$0xff] }
0x1073   :  { %v3861_v40 = vpack.c.bf16 %v1369_v38, %v1368_v37 }
0x1074   :  { %952 = vrot.lane.b32.xlu0 %v950_v45, %s3549_s6 }
0x10e6   :  { %v953_v54 = vpop.permute.xlu0 %952 }
0x10e7   :  { %956 = vst.msk [vmem:[#allocation2 + $0xa] sm:$0x3] %vm430_vm2, %v953_v54  ;;  %2973 = vmatmul.mubr.msk.f32.vlgmr.msra.gmra.mrb[6].mxu1 %vm185_vm1, %v953_v54 }
0x10e8   :  { %2994 = vmatprep.mubr.msk.f32.mxu1 %vm185_vm1, %v1209_v55  ;;  %3162 = vmatpush3.bf16.msra.mxu1 %v3159_v32 }
0x10e9   :  { %3164 = vmatprep.subr.bf16.mxu1 %v3163_v34 }
0x10ec   :  { %3166 = vmatpush3.bf16.msra.mxu1 %v3163_v34 }
0x10ed   :  { %3173 = vmatprep.subr.bf16.mxu1 %v3554_v3 }
0x10ee   :  { %v1172_v45 = vld [vmem:[#allocation2 + $0xa] sm:$0x3] }
0x10ef   :  { %v1210_v47 = vcombine.low %v1171_v46, %v1172_v45 }
0x10f1   :  { %v1218_v51 = vrot.slane %v1210_v47, %v3726_v10 }
0x11ba   :  { %v1027_v57 = vpop.f32.mrb[6].mxu1 }
0x11bb   :  { %v1031_v58 = vadd.f32 %v1027_v57, %v958_v56  ;;  %v2974_v59 = vpop.f32.mrb[7].mxu1  ;;  %v2756_v56 = vld [vmem:[%s4105_s8] ss:$0 sm:$0xff] }
0x11bc   :  { %v1227_v57 = vcombine.low %v2756_v56, %v2756_v56 }
0x11bd   :  { %3290 = vtanh.f32 %v1031_v58  ;;  %v2753_v61 = vmul.f32 -1.442695, %v1031_v58 }
0x11be   :  { %v1234_v58 = vrot.slane %v1227_v57, %v3726_v10 }
0x11bf   :  { %3292 = vpow2.f32 %v2753_v61 }
0x11c0   :  { %v1235_v59 = vcombine.low %v1234_v58, %v1234_v58 }
0x11c7   :  { %v3291_v60 = vpop.eup %3290 }
0x11c8   :  { %1041 = vrot.lane.b32.xlu1 %v3291_v60, %s3557_s4 }
0x11c9   :  { %v3293_v62 = vpop.eup %3292 }
0x11ca   :  { %v1035_v63 = vadd.f32 1.0, %v3293_v62 }
0x11cc   :  { %3294 = vrcp.f32 %v1035_v63 }
0x11d6   :  { %v3295_v0 = vpop.eup %3294 }
0x11d7   :  { %v1039_v5 = vmul.f32 %v3295_v0, %v944_v42  ;;  %v3867_v42 = vpack.c.bf16 %v1371_v36, %v1370_v39 }
0x123a   :  { %v1042_v1 = vpop.permute.xlu1 %1041 }
0x123b   :  { %v1044_v2 = vmul.f32 %v3295_v0, %v1042_v1 }
0x123d   :  { %1046 = vrot.lane.b32.xlu0 %v1044_v2, %s3549_s6 }
0x12af   :  { %v1047_v6 = vpop.permute.xlu0 %1046 }
0x12b0   :  { %v1049_v7 = vadd.f32 %v1047_v6, %v1039_v5 }
0x12b2   :  { %3296 = vtanh.f32 %v1049_v7 }
0x12bc   :  { %v3297_v8 = vpop.eup %3296 }
0x12bd   :  { %1052 = vrot.lane.b32.xlu1 %v3297_v8, %s3557_s4 }
0x132f   :  { %v1053_v9 = vpop.permute.xlu1 %1052 }
0x1330   :  { %v1055_v11 = vmul.f32 %v3295_v0, %v1053_v9 }
0x1332   :  { %1057 = vrot.lane.b32.xlu0 %v1055_v11, %s3549_s6 }
0x13a4   :  { %v1058_v12 = vpop.permute.xlu0 %1057 }
0x13a5   :  { %1061 = vst.msk [vmem:[#allocation2 + $0xc] sm:$0x3] %vm430_vm2, %v1058_v12  ;;  %2984 = vmatmul.mubr.msk.f32.vlgmr.msra.gmra.mrb[8].mxu0 %vm185_vm1, %v1058_v12 }
0x13a6   :  { %3005 = vmatprep.mubr.msk.f32.mxu0 %vm3555_vm0, %v3556_v4  ;;  %3169 = vmatpush3.bf16.msra.mxu0 %v3861_v40 }
0x13a7   :  { %3170 = vmatprep.subr.bf16.mxu0 %v3554_v3 }
0x13aa   :  { %3172 = vmatpush3.bf16.msra.mxu0 %v3867_v42 }
0x13ab   :  { %3179 = vmatprep.subr.bf16.mxu0 %v3554_v3 }
0x13ac   :  { %v1173_v48 = vld [vmem:[#allocation2 + $0xc] sm:$0x3] }
0x13ad   :  { %3006 = vmatmul.mubr.msk.f32.vlgmr.msra.gmra.mrb[10].mxu0 %vm185_vm1, %v1372_v43 }
0x13ae   :  { %3181 = vmatpush3.bf16.msra.mxu0 %v3861_v40  ;;  %3027 = vmatprep.mubr.msk.f32.mxu0 %vm3555_vm0, %v3556_v4 }
0x13af   :  { %3182 = vmatprep.subr.bf16.mxu0 %v3554_v3 }
0x13b2   :  { %3184 = vmatpush3.bf16.msra.mxu0 %v3867_v42 }
0x13b3   :  { %3191 = vmatprep.subr.bf16.mxu0 %v3554_v3 }
0x1478   :  { %v1132_v14 = vpop.f32.mrb[8].mxu0 }
0x1479   :  { %v1136_v15 = vadd.f32 %v1132_v14, %v1063_v13  ;;  %v2985_v16 = vpop.f32.mrb[9].mxu0 }
0x147b   :  { %3298 = vtanh.f32 %v1136_v15  ;;  %v2755_v18 = vmul.f32 -1.442695, %v1136_v15 }
0x147d   :  { %3300 = vpow2.f32 %v2755_v18 }
0x1480   :  { %v1444_v54 = vpop.f32.mrb[10].mxu0 }
0x1481   :  { %v3007_v55 = vpop.f32.mrb[11].mxu0 }
0x1485   :  { %v3299_v17 = vpop.eup %3298 }
0x1486   :  { %1146 = vrot.lane.b32.xlu1 %v3299_v17, %s3557_s4 }
0x1487   :  { %v3301_v19 = vpop.eup %3300 }
0x1488   :  { %v1140_v20 = vadd.f32 1.0, %v3301_v19 }
0x148a   :  { %3302 = vrcp.f32 %v1140_v20 }
0x1494   :  { %v3303_v21 = vpop.eup %3302 }
0x1495   :  { %v1144_v24 = vmul.f32 %v3303_v21, %v1049_v7 }
0x14f8   :  { %v1147_v22 = vpop.permute.xlu1 %1146 }
0x14f9   :  { %v1149_v23 = vmul.f32 %v3303_v21, %v1147_v22 }
0x14fb   :  { %1151 = vrot.lane.b32.xlu0 %v1149_v23, %s3549_s6 }
0x156d   :  { %v1152_v25 = vpop.permute.xlu0 %1151 }
0x156e   :  { %v1154_v26 = vadd.f32 %v1152_v25, %v1144_v24 }
0x1570   :  { %3304 = vtanh.f32 %v1154_v26 }
0x157a   :  { %v3305_v27 = vpop.eup %3304 }
0x157b   :  { %1157 = vrot.lane.b32.xlu1 %v3305_v27, %s3557_s4 }
0x15ed   :  { %v1158_v35 = vpop.permute.xlu1 %1157 }
0x15ee   :  { %v1160_v31 = vmul.f32 %v3303_v21, %v1158_v35 }
0x15f0   :  { %1162 = vrot.lane.b32.xlu0 %v1160_v31, %s3549_s6 }
0x15f4   :  { %1457 = vrot.lane.b32.xlu0 %v1373_v41, %s3549_s6 }
0x1662   :  { %v1163_v44 = vpop.permute.xlu0 %1162 }
0x1663   :  { %1166 = vst.msk [vmem:[#allocation2 + $0xe] sm:$0x3] %vm430_vm2, %v1163_v44 }
0x1666   :  { %v1458_v22 = vpop.permute.xlu0 %1457 }
0x166a   :  { %v1174_v49 = vld [vmem:[#allocation2 + $0xe] sm:$0x3] }
0x166b   :  { %v1211_v50 = vcombine.low %v1173_v48, %v1174_v49 }
0x166d   :  { %v1225_v52 = vrot.slane %v1211_v50, %v3726_v10 }
0x166f   :  { %v1226_v53 = vcombine.low %v1218_v51, %v1225_v52 }
0x1671   :  { %2995 = vmatmul.mubr.msk.f32.vlgmr.msra.gmra.mrb[8].mxu1 %vm185_vm1, %v1226_v53 }
0x1672   :  { %3175 = vmatpush3.bf16.msra.mxu1 %v3861_v40  ;;  %3016 = vmatprep.mubr.msk.f32.mxu1 %vm3555_vm0, %v3556_v4 }
0x1673   :  { %3176 = vmatprep.subr.bf16.mxu1 %v3554_v3 }
0x1676   :  { %3178 = vmatpush3.bf16.msra.mxu1 %v3867_v42 }
0x1677   :  { %3185 = vmatprep.subr.bf16.mxu1 %v3554_v3 }
0x1744   :  { %v2996_v60 = vpop.f32.mrb[8].mxu1 }
0x1745   :  { %v1313_v61 = vadd.f32 %v2996_v60, %v1235_v59  ;;  %v1307_v62 = vpop.f32.mrb[9].mxu1 }
0x1746   :  { %v1308_v63 = vadd.f32 %v1307_v62, %v1235_v59 }
0x1747   :  { %v1335_v0 = vcombine.high %v1313_v61, %v1313_v61  ;;  %v1342_v1 = vrot.slane %v1313_v61, %v3726_v10  ;;  %2761 = vst.sshfl [vmem:[#allocation4 + $0x8] sm:$0x3 pattern:$0x76325410] %v1313_v61 }
0x1748   :  { %v1318_v2 = vcombine.high %v1308_v63, %v1308_v63  ;;  %v1325_v5 = vrot.slane %v1308_v63, %v3726_v10  ;;  %2759 = vst.sshfl [vmem:[#allocation4] sm:$0x3 pattern:$0x76325410] %v1308_v63 }
0x1749   :  { %v1349_v6 = vrot.slane %v1335_v0, %v3726_v10  ;;  %v1350_v7 = vcombine.high %v1342_v1, %v1342_v1  ;;  %2762 = vst.sshfl [vmem:[#allocation4 + $0xc] sm:$0x3 pattern:$0x76325410] %v1335_v0 }
0x174a   :  { %v1332_v8 = vrot.slane %v1318_v2, %v3726_v10  ;;  %v1333_v9 = vcombine.high %v1325_v5, %v1325_v5  ;;  %2760 = vst.sshfl [vmem:[#allocation4 + $0x4] sm:$0x3 pattern:$0x76325410] %v1318_v2 }
0x174b   :  { %v1351_v11 = vcombine.high %v1349_v6, %v1349_v6  ;;  %1365 = vst [vmem:[#allocation4 + $0xa] sm:$0x3] %v1350_v7 }
0x174c   :  { %v1334_v12 = vcombine.high %v1332_v8, %v1332_v8  ;;  %1361 = vst [vmem:[#allocation4 + $0x2] sm:$0x3] %v1333_v9 }
0x174d   :  { %1367 = vst [vmem:[#allocation4 + $0xe] sm:$0x3] %v1351_v11 }
0x174e   :  { %1363 = vst [vmem:[#allocation4 + $0x6] sm:$0x3] %v1334_v12 }
0x174f   :  { %v1374_v13 = vld [vmem:[#allocation4] sm:$0x3] }
0x1750   :  { %v1448_v14 = vadd.f32 %v1444_v54, %v1374_v13 }
0x1751   :  { %v1586_v50 = vld [vmem:[#allocation4 + $0x4] sm:$0x3] }
0x1752   :  { %3306 = vtanh.f32 %v1448_v14  ;;  %v2764_v16 = vmul.f32 -1.442695, %v1448_v14 }
0x1753   :  { %v1482_v30 = vld [vmem:[#allocation4 + $0x2] sm:$0x3] }
0x1754   :  { %3308 = vpow2.f32 %v2764_v16 }
0x1755   :  { %v1690_v6 = vld [vmem:[#allocation4 + $0x6] sm:$0x3] }
0x175c   :  { %v3307_v15 = vpop.eup %3306 }
0x175d   :  { %1462 = vrot.lane.b32.xlu1 %v3307_v15, %s3557_s4 }
0x175e   :  { %v3309_v17 = vpop.eup %3308 }
0x175f   :  { %v1452_v18 = vadd.f32 1.0, %v3309_v17 }
0x1761   :  { %3310 = vrcp.f32 %v1452_v18 }
0x176b   :  { %v3311_v19 = vpop.eup %3310 }
0x176c   :  { %v1460_v23 = vmul.f32 %v3311_v19, %v1458_v22 }
0x17cf   :  { %v1463_v20 = vpop.permute.xlu1 %1462 }
0x17d0   :  { %v1465_v21 = vmul.f32 %v3311_v19, %v1463_v20 }
0x17d2   :  { %1467 = vrot.lane.b32.xlu1 %v1465_v21, %s3549_s6 }
0x1844   :  { %v1468_v24 = vpop.permute.xlu1 %1467 }
0x1845   :  { %v1470_v25 = vadd.f32 %v1468_v24, %v1460_v23 }
0x1847   :  { %3312 = vtanh.f32 %v1470_v25 }
0x1851   :  { %v3313_v26 = vpop.eup %3312 }
0x1852   :  { %1473 = vrot.lane.b32.xlu0 %v3313_v26, %s3557_s4 }
0x18c4   :  { %v1474_v27 = vpop.permute.xlu0 %1473 }
0x18c5   :  { %v1476_v28 = vmul.f32 %v3311_v19, %v1474_v27 }
0x18c7   :  { %1478 = vrot.lane.b32.xlu1 %v1476_v28, %s3549_s6 }
0x1939   :  { %v1479_v29 = vpop.permute.xlu1 %1478 }
0x193a   :  { %1481 = vst.msk [vmem:[#allocation3] sm:$0x3] %vm430_vm2, %v1479_v29  ;;  %3017 = vmatmul.mubr.msk.f32.vlgmr.msra.gmra.mrb[10].mxu1 %vm185_vm1, %v1479_v29 }
0x193b   :  { %3187 = vmatpush3.bf16.msra.mxu1 %v3861_v40  ;;  %3038 = vmatprep.mubr.msk.f32.mxu1 %vm3555_vm0, %v3556_v4 }
0x193c   :  { %3188 = vmatprep.subr.bf16.mxu1 %v3554_v3 }
0x193f   :  { %3190 = vmatpush3.bf16.msra.mxu1 %v3867_v42 }
0x1940   :  { %3197 = vmatprep.subr.bf16.mxu1 %v3554_v3 }
0x1a0d   :  { %v1551_v32 = vpop.f32.mrb[10].mxu1 }
0x1a0e   :  { %v1555_v33 = vadd.f32 %v1551_v32, %v1482_v30  ;;  %v3018_v34 = vpop.f32.mrb[11].mxu1 }
0x1a10   :  { %3314 = vtanh.f32 %v1555_v33  ;;  %v2766_v31 = vmul.f32 -1.442695, %v1555_v33 }
0x1a12   :  { %3316 = vpow2.f32 %v2766_v31 }
0x1a1a   :  { %v3315_v35 = vpop.eup %3314 }
0x1a1b   :  { %1565 = vrot.lane.b32.xlu0 %v3315_v35, %s3557_s4 }
0x1a1c   :  { %v3317_v37 = vpop.eup %3316 }
0x1a1d   :  { %v1559_v38 = vadd.f32 1.0, %v3317_v37 }
0x1a1f   :  { %3318 = vrcp.f32 %v1559_v38 }
0x1a29   :  { %v3319_v39 = vpop.eup %3318 }
0x1a2a   :  { %v1563_v43 = vmul.f32 %v3319_v39, %v1470_v25  ;;  %v1794_v25 = vld [vmem:[#allocation4 + $0x8] sm:$0x3] }
0x1a8d   :  { %v1566_v36 = vpop.permute.xlu0 %1565 }
0x1a8e   :  { %v1568_v41 = vmul.f32 %v3319_v39, %v1566_v36 }
0x1a90   :  { %1570 = vrot.lane.b32.xlu1 %v1568_v41, %s3549_s6 }
0x1b02   :  { %v1571_v44 = vpop.permute.xlu1 %1570 }
0x1b03   :  { %v1573_v45 = vadd.f32 %v1571_v44, %v1563_v43 }
0x1b05   :  { %3320 = vtanh.f32 %v1573_v45 }
0x1b0f   :  { %v3321_v46 = vpop.eup %3320 }
0x1b10   :  { %1576 = vrot.lane.b32.xlu0 %v3321_v46, %s3557_s4 }
0x1b82   :  { %v1577_v47 = vpop.permute.xlu0 %1576 }
0x1b83   :  { %v1579_v48 = vmul.f32 %v3319_v39, %v1577_v47 }
0x1b85   :  { %1581 = vrot.lane.b32.xlu1 %v1579_v48, %s3549_s6 }
0x1bf7   :  { %v1582_v49 = vpop.permute.xlu1 %1581 }
0x1bf8   :  { %1585 = vst.msk [vmem:[#allocation3 + $0x2] sm:$0x3] %vm430_vm2, %v1582_v49  ;;  %3028 = vmatmul.mubr.msk.f32.vlgmr.msra.gmra.mrb[12].mxu0 %vm185_vm1, %v1582_v49 }
0x1bf9   :  { %3193 = vmatpush3.bf16.msra.mxu0 %v3861_v40  ;;  %3049 = vmatprep.mubr.msk.f32.mxu0 %vm3555_vm0, %v3556_v4 }
0x1bfa   :  { %3194 = vmatprep.subr.bf16.mxu0 %v3554_v3 }
0x1bfd   :  { %3196 = vmatpush3.bf16.msra.mxu0 %v3867_v42 }
0x1bfe   :  { %3203 = vmatprep.subr.bf16.mxu0 %v3554_v3 }
0x1ccb   :  { %v1655_v51 = vpop.f32.mrb[12].mxu0 }
0x1ccc   :  { %v1659_v52 = vadd.f32 %v1655_v51, %v1586_v50  ;;  %v3029_v53 = vpop.f32.mrb[13].mxu0 }
0x1cce   :  { %3322 = vtanh.f32 %v1659_v52  ;;  %v2768_v55 = vmul.f32 -1.442695, %v1659_v52 }
0x1cd0   :  { %3324 = vpow2.f32 %v2768_v55 }
0x1cd8   :  { %v3323_v54 = vpop.eup %3322 }
0x1cd9   :  { %1669 = vrot.lane.b32.xlu0 %v3323_v54, %s3557_s4 }
0x1cda   :  { %v3325_v56 = vpop.eup %3324 }
0x1cdb   :  { %v1663_v57 = vadd.f32 1.0, %v3325_v56 }
0x1cdd   :  { %3326 = vrcp.f32 %v1663_v57 }
0x1ce7   :  { %v3327_v58 = vpop.eup %3326 }
0x1ce8   :  { %v1667_v61 = vmul.f32 %v3327_v58, %v1573_v45  ;;  %v1898_v45 = vld [vmem:[#allocation4 + $0xa] sm:$0x3] }
0x1d4b   :  { %v1670_v59 = vpop.permute.xlu0 %1669 }
0x1d4c   :  { %v1672_v60 = vmul.f32 %v3327_v58, %v1670_v59  ;;  %v3965_v59 = vld [vmem:[#allocation3 + $0x2] sm:$0x3] }
0x1d4e   :  { %1674 = vrot.lane.b32.xlu1 %v1672_v60, %s3549_s6 }
0x1dc0   :  { %v1675_v62 = vpop.permute.xlu1 %1674 }
0x1dc1   :  { %v1677_v63 = vadd.f32 %v1675_v62, %v1667_v61  ;;  %v3971_v62 = vld [vmem:[#allocation3] sm:$0x3] }
0x1dc3   :  { %3328 = vtanh.f32 %v1677_v63 }
0x1dcd   :  { %v3329_v0 = vpop.eup %3328 }
0x1dce   :  { %1680 = vrot.lane.b32.xlu0 %v3329_v0, %s3557_s4 }
0x1e40   :  { %v1681_v1 = vpop.permute.xlu0 %1680 }
0x1e41   :  { %v1683_v2 = vmul.f32 %v3327_v58, %v1681_v1 }
0x1e43   :  { %1685 = vrot.lane.b32.xlu1 %v1683_v2, %s3549_s6 }
0x1eb5   :  { %v1686_v5 = vpop.permute.xlu1 %1685 }
0x1eb6   :  { %1689 = vst.msk [vmem:[#allocation3 + $0x4] sm:$0x3] %vm430_vm2, %v1686_v5  ;;  %3039 = vmatmul.mubr.msk.f32.vlgmr.msra.gmra.mrb[12].mxu1 %vm185_vm1, %v1686_v5 }
0x1eb7   :  { %3199 = vmatpush3.bf16.msra.mxu1 %v3861_v40  ;;  %3060 = vmatprep.mubr.msk.f32.mxu1 %vm3555_vm0, %v3556_v4 }
0x1eb8   :  { %3200 = vmatprep.subr.bf16.mxu1 %v3554_v3 }
0x1ebb   :  { %3202 = vmatpush3.bf16.msra.mxu1 %v3867_v42 }
0x1ebc   :  { %3209 = vmatprep.subr.bf16.mxu1 %v3554_v3 }
0x1ebd   :  { %v3967_v60 = vld [vmem:[#allocation3 + $0x4] sm:$0x3] }
0x1f89   :  { %v1759_v7 = vpop.f32.mrb[12].mxu1 }
0x1f8a   :  { %v1763_v8 = vadd.f32 %v1759_v7, %v1690_v6  ;;  %v3040_v9 = vpop.f32.mrb[13].mxu1  ;;  %v2002_v6 = vld [vmem:[#allocation4 + $0xc] sm:$0x3] }
0x1f8c   :  { %3330 = vtanh.f32 %v1763_v8  ;;  %v2770_v12 = vmul.f32 -1.442695, %v1763_v8 }
0x1f8e   :  { %3332 = vpow2.f32 %v2770_v12 }
0x1f96   :  { %v3331_v11 = vpop.eup %3330 }
0x1f97   :  { %1773 = vrot.lane.b32.xlu0 %v3331_v11, %s3557_s4 }
0x1f98   :  { %v3333_v13 = vpop.eup %3332 }
0x1f99   :  { %v1767_v14 = vadd.f32 1.0, %v3333_v13 }
0x1f9b   :  { %3334 = vrcp.f32 %v1767_v14 }
0x1fa5   :  { %v3335_v15 = vpop.eup %3334 }
0x1fa6   :  { %v1771_v18 = vmul.f32 %v3335_v15, %v1677_v63  ;;  %v2236_v63 = vcombine.low %v3971_v62, %v3965_v59 }
0x1fa8   :  { %v2244_v1 = vrot.slane %v2236_v63, %v3726_v10  ;;  %v2779_v63 = vld [vmem:[%s4109_s12] ss:$0 sm:$0xff] }
0x2009   :  { %v1774_v16 = vpop.permute.xlu0 %1773 }
0x200a   :  { %v1776_v17 = vmul.f32 %v3335_v15, %v1774_v16 }
0x200c   :  { %1778 = vrot.lane.b32.xlu1 %v1776_v17, %s3549_s6 }
0x207e   :  { %v1779_v19 = vpop.permute.xlu1 %1778 }
0x207f   :  { %v1781_v20 = vadd.f32 %v1779_v19, %v1771_v18 }
0x2081   :  { %3336 = vtanh.f32 %v1781_v20 }
0x208b   :  { %v3337_v21 = vpop.eup %3336 }
0x208c   :  { %1784 = vrot.lane.b32.xlu0 %v3337_v21, %s3557_s4 }
0x20fe   :  { %v1785_v22 = vpop.permute.xlu0 %1784 }
0x20ff   :  { %v1787_v23 = vmul.f32 %v3335_v15, %v1785_v22 }
0x2101   :  { %1789 = vrot.lane.b32.xlu1 %v1787_v23, %s3549_s6 }
0x2173   :  { %v1790_v24 = vpop.permute.xlu1 %1789 }
0x2174   :  { %1793 = vst.msk [vmem:[#allocation3 + $0x6] sm:$0x3] %vm430_vm2, %v1790_v24  ;;  %3050 = vmatmul.mubr.msk.f32.vlgmr.msra.gmra.mrb[14].mxu0 %vm185_vm1, %v1790_v24 }
0x2175   :  { %3205 = vmatpush3.bf16.msra.mxu0 %v3861_v40  ;;  %3071 = vmatprep.mubr.msk.f32.mxu0 %vm3555_vm0, %v3556_v4 }
0x2176   :  { %3206 = vmatprep.subr.bf16.mxu0 %v3554_v3 }
0x2179   :  { %3208 = vmatpush3.bf16.msra.mxu0 %v3867_v42 }
0x217b   :  { %v3963_v58 = vld [vmem:[#allocation3 + $0x6] sm:$0x3] }
0x217c   :  { %v2237_v61 = vcombine.low %v3967_v60, %v3963_v58 }
0x217e   :  { %v2251_v0 = vrot.slane %v2237_v61, %v3726_v10 }
0x2180   :  { %v2252_v5 = vcombine.low %v2244_v1, %v2251_v0  ;;  %v2270_v0 = vcombine.low %v2779_v63, %v2779_v63 }
0x2182   :  { %v2277_v1 = vrot.slane %v2270_v0, %v3726_v10 }
0x2247   :  { %v1863_v26 = vpop.f32.mrb[14].mxu0 }
0x2248   :  { %v1867_v27 = vadd.f32 %v1863_v26, %v1794_v25  ;;  %v3051_v28 = vpop.f32.mrb[15].mxu0  ;;  %v2106_v25 = vld [vmem:[#allocation4 + $0xe] sm:$0x3] }
0x224a   :  { %3338 = vtanh.f32 %v1867_v27  ;;  %v2772_v30 = vmul.f32 -1.442695, %v1867_v27 }
0x224c   :  { %3340 = vpow2.f32 %v2772_v30 }
0x2254   :  { %v3339_v29 = vpop.eup %3338 }
0x2255   :  { %1877 = vrot.lane.b32.xlu0 %v3339_v29, %s3557_s4 }
0x2256   :  { %v3341_v32 = vpop.eup %3340 }
0x2257   :  { %v1871_v33 = vadd.f32 1.0, %v3341_v32 }
0x2259   :  { %3342 = vrcp.f32 %v1871_v33 }
0x2263   :  { %v3343_v34 = vpop.eup %3342 }
0x2264   :  { %v1875_v37 = vmul.f32 %v3343_v34, %v1781_v20 }
0x22c7   :  { %v1878_v35 = vpop.permute.xlu0 %1877 }
0x22c8   :  { %v1880_v31 = vmul.f32 %v3343_v34, %v1878_v35 }
0x22ca   :  { %1882 = vrot.lane.b32.xlu1 %v1880_v31, %s3549_s6 }
0x233c   :  { %v1883_v38 = vpop.permute.xlu1 %1882 }
0x233d   :  { %v1885_v39 = vadd.f32 %v1883_v38, %v1875_v37 }
0x233f   :  { %3344 = vtanh.f32 %v1885_v39 }
0x2349   :  { %v3345_v36 = vpop.eup %3344 }
0x234a   :  { %1888 = vrot.lane.b32.xlu0 %v3345_v36, %s3557_s4 }
0x23bc   :  { %v1889_v41 = vpop.permute.xlu0 %1888 }
0x23bd   :  { %v1891_v43 = vmul.f32 %v3343_v34, %v1889_v41  ;;  %v2218_v41 = vld [vmem:[%s4108_s11] sm:$0xff] }
0x23bf   :  { %1893 = vrot.lane.b32.xlu1 %v1891_v43, %s3549_s6  ;;  %v2219_v43 = vld [vmem:[%s4108_s11 + $0x8] sm:$0xff] }
0x2431   :  { %v1894_v44 = vpop.permute.xlu1 %1893 }
0x2432   :  { %1897 = vst.msk [vmem:[#allocation3 + $0x8] sm:$0x3] %vm430_vm2, %v1894_v44  ;;  %3061 = vmatmul.mubr.msk.f32.vlgmr.msra.gmra.mrb[14].mxu1 %vm185_vm1, %v1894_v44  ;;  %v2220_v44 = vld [vmem:[%s4108_s11 + $0x10] sm:$0xff] }
0x2433   :  { %3211 = vmatpush3.bf16.msra.mxu1 %v3861_v40  ;;  %3082 = vmatprep.mubr.msk.f32.mxu1 %vm3555_vm0, %v3556_v4 }
0x2434   :  { %3212 = vmatprep.subr.bf16.mxu1 %v3554_v3 }
0x2437   :  { %3214 = vmatpush3.bf16.msra.mxu1 %v3867_v42 }
0x2505   :  { %v1967_v46 = vpop.f32.mrb[14].mxu1 }
0x2506   :  { %v1971_v47 = vadd.f32 %v1967_v46, %v1898_v45  ;;  %v3062_v48 = vpop.f32.mrb[15].mxu1  ;;  %v3215_v45 = vpack.c.bf16 %v2219_v43, %v2218_v41  ;;  %v2221_v46 = vld [vmem:[%s4108_s11 + $0x18] sm:$0xff] }
0x2508   :  { %3346 = vtanh.f32 %v1971_v47  ;;  %v2774_v50 = vmul.f32 -1.442695, %v1971_v47  ;;  %v3219_v47 = vpack.c.bf16 %v2221_v46, %v2220_v44  ;;  %3216 = vmatprep.subr.bf16.mxu0 %v3215_v45 }
0x250a   :  { %3348 = vpow2.f32 %v2774_v50 }
0x2512   :  { %v3347_v49 = vpop.eup %3346 }
0x2513   :  { %1981 = vrot.lane.b32.xlu0 %v3347_v49, %s3557_s4 }
0x2514   :  { %v3349_v51 = vpop.eup %3348 }
0x2515   :  { %v1975_v52 = vadd.f32 1.0, %v3349_v51 }
0x2517   :  { %3350 = vrcp.f32 %v1975_v52  ;;  %v4005_v52 = vld [vmem:[#allocation3 + $0x8] sm:$0x3] }
0x2521   :  { %v3351_v40 = vpop.eup %3350 }
0x2522   :  { %v1979_v3 = vmul.f32 %v3351_v40, %v1885_v39 }
0x2585   :  { %v1982_v53 = vpop.permute.xlu0 %1981 }
0x2586   :  { %v1984_v4 = vmul.f32 %v3351_v40, %v1982_v53 }
0x2588   :  { %1986 = vrot.lane.b32.xlu1 %v1984_v4, %s3549_s6 }
0x25fa   :  { %v1987_v42 = vpop.permute.xlu1 %1986 }
0x25fb   :  { %v1989_v54 = vadd.f32 %v1987_v42, %v1979_v3 }
0x25fd   :  { %3352 = vtanh.f32 %v1989_v54 }
0x2607   :  { %v3353_v55 = vpop.eup %3352 }
0x2608   :  { %1992 = vrot.lane.b32.xlu0 %v3353_v55, %s3557_s4 }
0x267a   :  { %v1993_v56 = vpop.permute.xlu0 %1992 }
0x267b   :  { %v1995_v57 = vmul.f32 %v3351_v40, %v1993_v56  ;;  %v2411_v56 = vld [vmem:[%s4110_s13] sm:$0xff] }
0x267d   :  { %1997 = vrot.lane.b32.xlu1 %v1995_v57, %s3549_s6  ;;  %v2412_v57 = vld [vmem:[%s4110_s13 + $0x8] sm:$0xff] }
0x267e   :  { %v3223_v61 = vpack.c.bf16 %v2412_v57, %v2411_v56 }
0x2680   :  { %3224 = vmatprep.subr.bf16.mxu1 %v3223_v61 }
0x26ef   :  { %v1998_v2 = vpop.permute.xlu1 %1997 }
0x26f0   :  { %2001 = vst.msk [vmem:[#allocation3 + $0xa] sm:$0x3] %vm430_vm2, %v1998_v2  ;;  %3072 = vmatmul.mubr.msk.f32.vlgmr.msra.gmra.mrb[16].mxu0 %vm185_vm1, %v1998_v2  ;;  %v2278_v2 = vcombine.low %v2277_v1, %v2277_v1 }
0x26f1   :  { %3093 = vmatprep.mubr.msk.f32.mxu0 %vm185_vm1, %v2252_v5  ;;  %3218 = vmatpush3.bf16.msra.mxu0 %v3215_v45 }
0x26f2   :  { %3220 = vmatprep.subr.bf16.mxu0 %v3219_v47 }
0x26f5   :  { %3222 = vmatpush3.bf16.msra.mxu0 %v3219_v47 }
0x26f7   :  { %v4003_v51 = vld [vmem:[#allocation3 + $0xa] sm:$0x3] }
0x26f8   :  { %v2253_v40 = vcombine.low %v4005_v52, %v4003_v51 }
0x26fa   :  { %v2261_v42 = vrot.slane %v2253_v40, %v3726_v10 }
0x27c3   :  { %v2071_v7 = vpop.f32.mrb[16].mxu0 }
0x27c4   :  { %v2075_v8 = vadd.f32 %v2071_v7, %v2002_v6  ;;  %v3073_v9 = vpop.f32.mrb[17].mxu0 }
0x27c6   :  { %3354 = vtanh.f32 %v2075_v8  ;;  %v2776_v12 = vmul.f32 -1.442695, %v2075_v8 }
0x27c8   :  { %3356 = vpow2.f32 %v2776_v12 }
0x27d0   :  { %v3355_v11 = vpop.eup %3354 }
0x27d1   :  { %2085 = vrot.lane.b32.xlu0 %v3355_v11, %s3557_s4 }
0x27d2   :  { %v3357_v13 = vpop.eup %3356 }
0x27d3   :  { %v2079_v14 = vadd.f32 1.0, %v3357_v13 }
0x27d5   :  { %3358 = vrcp.f32 %v2079_v14 }
0x27df   :  { %v3359_v15 = vpop.eup %3358 }
0x27e0   :  { %v2083_v18 = vmul.f32 %v3359_v15, %v1989_v54 }
0x2843   :  { %v2086_v16 = vpop.permute.xlu0 %2085 }
0x2844   :  { %v2088_v17 = vmul.f32 %v3359_v15, %v2086_v16 }
0x2846   :  { %2090 = vrot.lane.b32.xlu1 %v2088_v17, %s3549_s6 }
0x28b8   :  { %v2091_v19 = vpop.permute.xlu1 %2090 }
0x28b9   :  { %v2093_v20 = vadd.f32 %v2091_v19, %v2083_v18 }
0x28bb   :  { %3360 = vtanh.f32 %v2093_v20 }
0x28c5   :  { %v3361_v21 = vpop.eup %3360 }
0x28c6   :  { %2096 = vrot.lane.b32.xlu0 %v3361_v21, %s3557_s4 }
0x2938   :  { %v2097_v22 = vpop.permute.xlu0 %2096 }
0x2939   :  { %v2099_v23 = vmul.f32 %v3359_v15, %v2097_v22 }
0x293b   :  { %2101 = vrot.lane.b32.xlu1 %v2099_v23, %s3549_s6 }
0x29ad   :  { %v2102_v24 = vpop.permute.xlu1 %2101 }
0x29ae   :  { %2105 = vst.msk [vmem:[#allocation3 + $0xc] sm:$0x3] %vm430_vm2, %v2102_v24  ;;  %3083 = vmatmul.mubr.msk.f32.vlgmr.msra.gmra.mrb[16].mxu1 %vm185_vm1, %v2102_v24 }
0x29af   :  { %3226 = vmatpush3.bf16.msra.mxu1 %v3223_v61 }
0x29b5   :  { %v4009_v53 = vld [vmem:[#allocation3 + $0xc] sm:$0x3] }
0x2a81   :  { %v2175_v26 = vpop.f32.mrb[16].mxu1 }
0x2a82   :  { %v2179_v27 = vadd.f32 %v2175_v26, %v2106_v25  ;;  %v3084_v28 = vpop.f32.mrb[17].mxu1 }
0x2a84   :  { %3362 = vtanh.f32 %v2179_v27  ;;  %v2778_v30 = vmul.f32 -1.442695, %v2179_v27 }
0x2a86   :  { %3364 = vpow2.f32 %v2778_v30 }
0x2a8e   :  { %v3363_v29 = vpop.eup %3362 }
0x2a8f   :  { %2189 = vrot.lane.b32.xlu0 %v3363_v29, %s3557_s4 }
0x2a90   :  { %v3365_v32 = vpop.eup %3364 }
0x2a91   :  { %v2183_v33 = vadd.f32 1.0, %v3365_v32 }
0x2a93   :  { %3366 = vrcp.f32 %v2183_v33 }
0x2a9d   :  { %v3367_v34 = vpop.eup %3366 }
0x2a9e   :  { %v2187_v37 = vmul.f32 %v3367_v34, %v2093_v20 }
0x2b01   :  { %v2190_v35 = vpop.permute.xlu0 %2189 }
0x2b02   :  { %v2192_v31 = vmul.f32 %v3367_v34, %v2190_v35 }
0x2b04   :  { %2194 = vrot.lane.b32.xlu1 %v2192_v31, %s3549_s6 }
0x2b76   :  { %v2195_v38 = vpop.permute.xlu1 %2194 }
0x2b77   :  { %v2197_v39 = vadd.f32 %v2195_v38, %v2187_v37 }
0x2b79   :  { %3368 = vtanh.f32 %v2197_v39  ;;  %v2782_v39 = vld [vmem:[%s4111_s14] ss:$0 sm:$0xff]  ;;  %s3558_s14 = smov [#allocation14]  }
0x2b7a   :  { %s2722_s3 = sshll.u32 %s3558_s14, 4  ;;  %s2723_s3 = int_to_ptr.vmem [resolvable:$true] %s2722_s3 }
0x2b7b   :  { %s3514_s17 = scalar_lea.vmem %s2723_s3, 32  ;;  %p3519_p13 = scmp.lt.s32.totalorder %s2723_s3, %s2723_s3 }
0x2b7c   :  { %p3515_p12 = scmp.ne.s32.totalorder %s2723_s3, %s3514_s17  ;;  %p3520_p0 = scmp.lt.s32.totalorder %s3514_s17, %s3514_s17 }
0x2b7e   :  { %p3521_p1 = por %p3520_p0, %p3519_p13 }
0x2b80   :  { %p3522_p2 = pnand %p3521_p1, %p3515_p12 }
0x2b83   :  { %v3369_v36 = vpop.eup %3368 }
0x2b84   :  { %2200 = vrot.lane.b32.xlu0 %v3369_v36, %s3557_s4  ;;  %v2461_v36 = vcombine.low %v2782_v39, %v2782_v39 }
0x2b86   :  { %v2468_v41 = vrot.slane %v2461_v36, %v3726_v10 }
0x2b88   :  { %v2469_v43 = vcombine.low %v2468_v41, %v2468_v41 }
0x2bf6   :  { %v2201_v48 = vpop.permute.xlu0 %2200 }
0x2bf7   :  { %v2203_v49 = vmul.f32 %v3367_v34, %v2201_v48 }
0x2bf9   :  { %2205 = vrot.lane.b32.xlu1 %v2203_v49, %s3549_s6 }
0x2c6b   :  { %v2206_v50 = vpop.permute.xlu1 %2205 }
0x2c6c   :  { %2209 = vst.msk [vmem:[#allocation3 + $0xe] sm:$0x3] %vm430_vm2, %v2206_v50 }
0x2c73   :  { %v4011_v4 = vld [vmem:[#allocation3 + $0xe] sm:$0x3] }
0x2c74   :  { %v2254_v3 = vcombine.low %v4009_v53, %v4011_v4 }
0x2c76   :  { %v2268_v54 = vrot.slane %v2254_v3, %v3726_v10 }
0x2c78   :  { %v2269_v55 = vcombine.low %v2261_v42, %v2268_v54 }
0x2c7a   :  { %3094 = vmatmul.mubr.msk.f32.vlgmr.msra.gmra.mrb[18].mxu0 %vm185_vm1, %v2269_v55 }
0x2d4d   :  { %v3095_v5 = vpop.f32.mrb[18].mxu0 }
0x2d4e   :  { %v2356_v6 = vadd.f32 %v3095_v5, %v2278_v2  ;;  %v2350_v7 = vpop.f32.mrb[19].mxu0 }
0x2d4f   :  { %v2351_v8 = vadd.f32 %v2350_v7, %v2278_v2 }
0x2d50   :  { %v2378_v9 = vcombine.high %v2356_v6, %v2356_v6  ;;  %v2385_v11 = vrot.slane %v2356_v6, %v3726_v10 }
0x2d51   :  { %v2361_v12 = vcombine.high %v2351_v8, %v2351_v8  ;;  %v2368_v13 = vrot.slane %v2351_v8, %v3726_v10 }
0x2d52   :  { %v2392_v14 = vrot.slane %v2378_v9, %v3726_v10  ;;  %v2393_v15 = vcombine.high %v2385_v11, %v2385_v11  ;;  %3370 = vtanh.f32 %v2385_v11 }
0x2d53   :  { %v2375_v16 = vrot.slane %v2361_v12, %v3726_v10  ;;  %v2376_v17 = vcombine.high %v2368_v13, %v2368_v13  ;;  %3372 = vtanh.f32 %v2368_v13 }
0x2d54   :  { %v2394_v18 = vcombine.high %v2392_v14, %v2392_v14  ;;  %3374 = vtanh.f32 %v2393_v15 }
0x2d55   :  { %3376 = vtanh.f32 %v2392_v14  ;;  %v2377_v19 = vcombine.high %v2375_v16, %v2375_v16 }
0x2d56   :  { %3378 = vtanh.f32 %v2394_v18 }
0x2d57   :  { %3380 = vtanh.f32 %v2376_v17 }
0x2d58   :  { %3382 = vtanh.f32 %v2375_v16 }
0x2d59   :  { %3384 = vtanh.f32 %v2377_v19 }
0x2d5c   :  { %v3371_v20 = vpop.eup %3370 }
0x2d5d   :  { %v3373_v21 = vpop.eup %3372 }
0x2d5e   :  { %v3375_v22 = vpop.eup %3374 }
0x2d5f   :  { %v3377_v23 = vpop.eup %3376  ;;  %v2444_v30 = vcombine.low %v3371_v20, %v3375_v22 }
0x2d60   :  { %v3379_v24 = vpop.eup %3378 }
0x2d61   :  { %v3381_v25 = vpop.eup %3380  ;;  %v2445_v26 = vcombine.low %v3377_v23, %v3379_v24  ;;  %v2452_v31 = vrot.slane %v2444_v30, %v3726_v10 }
0x2d62   :  { %v3383_v27 = vpop.eup %3382  ;;  %v2427_v28 = vcombine.low %v3373_v21, %v3381_v25 }
0x2d63   :  { %v3385_v29 = vpop.eup %3384  ;;  %v2459_v33 = vrot.slane %v2445_v26, %v3726_v10 }
0x2d64   :  { %v2428_v32 = vcombine.low %v3383_v27, %v3385_v29  ;;  %v2435_v34 = vrot.slane %v2427_v28, %v3726_v10 }
0x2d65   :  { %v2460_v38 = vcombine.low %v2452_v31, %v2459_v33 }
0x2d66   :  { %v2442_v35 = vrot.slane %v2428_v32, %v3726_v10 }
0x2d68   :  { %v2443_v37 = vcombine.low %v2435_v34, %v2442_v35 }
0x2d6a   :  { %3100 = vmatprep.mubr.msk.f32.mxu1 %vm2471_vm3, %v2443_v37 }
0x2d6b   :  { %3101 = vmatmul.mubr.msk.f32.vlgmr.msra.gmra.mrb[18].mxu1 %vm2471_vm3, %v2460_v38 }
0x2e3e   :  { %v3102_v44 = vpop.f32.mrb[18].mxu1 }
0x2e3f   :  { %v2548_v45 = vadd.f32 %v3102_v44, %v2469_v43  ;;  %v2542_v46 = vpop.f32.mrb[19].mxu1 }
0x2e40   :  { %v2543_v47 = vadd.f32 %v2542_v46, %v2469_v43 }
0x2e41   :  { %v2570_v48 = vcombine.high %v2548_v45, %v2548_v45  ;;  %v2577_v49 = vrot.slane %v2548_v45, %v3726_v10 }
0x2e42   :  { %v2553_v50 = vcombine.high %v2543_v47, %v2543_v47  ;;  %v2560_v40 = vrot.slane %v2543_v47, %v3726_v10 }
0x2e43   :  { %v2584_v3 = vrot.slane %v2570_v48, %v3726_v10  ;;  %v2585_v42 = vcombine.high %v2577_v49, %v2577_v49  ;;  %v2600_v54 = vsel %vm2595_vm4, %v2577_v49, -inf }
0x2e44   :  { %v2567_v55 = vrot.slane %v2553_v50, %v3726_v10  ;;  %v2568_v56 = vcombine.high %v2560_v40, %v2560_v40  ;;  %v2596_v57 = vsel %vm2595_vm4, %v2560_v40, -inf }
0x2e45   :  { %v2586_v61 = vcombine.high %v2584_v3, %v2584_v3  ;;  %v2602_v63 = vsel %vm2595_vm4, %v2585_v42, -inf  ;;  %v2604_v0 = vsel %vm2595_vm4, %v2584_v3, -inf  ;;  %v2601_v1 = vmax.f32 %v2596_v57, %v2600_v54 }
0x2e46   :  { %v2569_v2 = vcombine.high %v2567_v55, %v2567_v55  ;;  %v2597_v5 = vsel %vm2595_vm4, %v2568_v56, -inf  ;;  %v2598_v6 = vsel %vm2595_vm4, %v2567_v55, -inf }
0x2e47   :  { %v2606_v7 = vsel %vm2595_vm4, %v2586_v61, -inf  ;;  %v2603_v8 = vmax.f32 %v2597_v5, %v2602_v63  ;;  %v2605_v9 = vmax.f32 %v2598_v6, %v2604_v0 }
0x2e48   :  { %v2599_v10 = vsel %vm2595_vm4, %v2569_v2, -inf }
0x2e49   :  { %v2607_v11 = vmax.f32 %v2599_v10, %v2606_v7  ;;  %v2608_v12 = vmax.f32 %v2601_v1, %v2603_v8 }
0x2e4b   :  { %v2609_v13 = vmax.f32 %v2605_v9, %v2607_v11 }
0x2e4d   :  { %v2610_v14 = vmax.f32 %v2608_v12, %v2609_v13 }
0x2e4f   :  { %v2611_v15 = vsub.f32 %v2560_v40, %v2610_v14  ;;  %v2612_v16 = vsub.f32 %v2568_v56, %v2610_v14  ;;  %v2613_v17 = vsub.f32 %v2567_v55, %v2610_v14  ;;  %v2614_v18 = vsub.f32 %v2569_v2, %v2610_v14 }
0x2e50   :  { %v2615_v19 = vsub.f32 %v2577_v49, %v2610_v14  ;;  %v2616_v20 = vsub.f32 %v2585_v42, %v2610_v14  ;;  %v2617_v21 = vsub.f32 %v2584_v3, %v2610_v14  ;;  %v2618_v22 = vsub.f32 %v2586_v61, %v2610_v14 }
0x2e51   :  { %v2619_v23 = vmul.f32 1.442695, %v2611_v15  ;;  %v2621_v24 = vmul.f32 1.442695, %v2612_v16  ;;  %v2623_v25 = vmul.f32 1.442695, %v2613_v17 }
0x2e52   :  { %v2625_v26 = vmul.f32 1.442695, %v2614_v18  ;;  %v2627_v27 = vmul.f32 1.442695, %v2615_v19  ;;  %v2629_v28 = vmul.f32 1.442695, %v2616_v20 }
0x2e53   :  { %3386 = vpow2.f32 %v2619_v23  ;;  %v2631_v29 = vmul.f32 1.442695, %v2617_v21  ;;  %v2633_v30 = vmul.f32 1.442695, %v2618_v22 }
0x2e54   :  { %3388 = vpow2.f32 %v2621_v24 }
0x2e55   :  { %3390 = vpow2.f32 %v2623_v25 }
0x2e56   :  { %3392 = vpow2.f32 %v2625_v26 }
0x2e57   :  { %3394 = vpow2.f32 %v2627_v27 }
0x2e58   :  { %3396 = vpow2.f32 %v2629_v28 }
0x2e59   :  { %3398 = vpow2.f32 %v2631_v29 }
0x2e5a   :  { %3400 = vpow2.f32 %v2633_v30 }
0x2e5d   :  { %v3387_v32 = vpop.eup %3386 }
0x2e5e   :  { %v3389_v33 = vpop.eup %3388  ;;  %v2635_v34 = vsel %vm2595_vm4, %v3387_v32, 0.0 }
0x2e5f   :  { %v3391_v35 = vpop.eup %3390  ;;  %v2636_v31 = vsel %vm2595_vm4, %v3389_v33, 0.0 }
0x2e60   :  { %v3393_v37 = vpop.eup %3392  ;;  %v2637_v38 = vadd.f32 %v2636_v31, %v2635_v34  ;;  %v2638_v39 = vsel %vm2595_vm4, %v3391_v35, 0.0 }
0x2e61   :  { %v3395_v36 = vpop.eup %3394  ;;  %v2640_v43 = vsel %vm2595_vm4, %v3393_v37, 0.0 }
0x2e62   :  { %v2639_v41 = vadd.f32 %v2638_v39, %v2637_v38  ;;  %v3397_v44 = vpop.eup %3396  ;;  %v2642_v46 = vsel %vm2595_vm4, %v3395_v36, 0.0 }
0x2e63   :  { %v3399_v47 = vpop.eup %3398  ;;  %v2644_v49 = vsel %vm2595_vm4, %v3397_v44, 0.0 }
0x2e64   :  { %v2641_v45 = vadd.f32 %v2640_v43, %v2639_v41  ;;  %v3401_v50 = vpop.eup %3400  ;;  %v2646_v3 = vsel %vm2595_vm4, %v3399_v47, 0.0 }
0x2e65   :  { %v2648_v54 = vsel %vm2595_vm4, %v3401_v50, 0.0 }
0x2e66   :  { %v2643_v48 = vadd.f32 %v2642_v46, %v2641_v45 }
0x2e68   :  { %v2645_v40 = vadd.f32 %v2644_v49, %v2643_v48 }
0x2e6a   :  { %v2647_v42 = vadd.f32 %v2646_v3, %v2645_v40 }
0x2e6c   :  { %v2649_v55 = vadd.f32 %v2648_v54, %v2647_v42 }
0x2e6e   :  { %3402 = vrcp.f32 %v2649_v55 }
0x2e78   :  { %v3403_v56 = vpop.eup %3402 }
0x2e79   :  { %v2652_v57 = vmul.f32 %v3403_v56, %v3389_v33  ;;  %v2651_v61 = vmul.f32 %v3403_v56, %v3387_v32  ;;  %v2655_v63 = vmul.f32 %v3403_v56, %v3395_v36  ;;  %v2653_v0 = vmul.f32 %v3403_v56, %v3391_v35 }
0x2e7a   :  { %v2657_v1 = vmul.f32 %v3403_v56, %v3399_v47  ;;  %v2654_v2 = vmul.f32 %v3403_v56, %v3393_v37  ;;  %v2656_v5 = vmul.f32 %v3403_v56, %v3397_v44  ;;  %v2658_v6 = vmul.f32 %v3403_v56, %v3401_v50 }
0x2e7b   :  { %v2662_v7 = vsel %vm2595_vm4, %v2652_v57, 0.0  ;;  %v2659_v8 = vsel %vm2595_vm4, %v2651_v61, 0.0  ;;  %v2671_v10 = vsel %vm2595_vm4, %v2655_v63, 0.0  ;;  %v2665_v11 = vsel %vm2595_vm4, %v2653_v0, 0.0 }
0x2e7c   :  { %2663 = vadd.xlane.f32.xlu1 %v2662_v7  ;;  %2660 = vadd.xlane.f32.xlu0 %v2659_v8  ;;  %v2680_v9 = vsel %vm2595_vm4, %v2658_v6, 0.0  ;;  %v2677_v12 = vsel %vm2595_vm4, %v2657_v1, 0.0  ;;  %v2668_v13 = vsel %vm2595_vm4, %v2654_v2, 0.0  ;;  %v2674_v14 = vsel %vm2595_vm4, %v2656_v5, 0.0 }
0x2e80   :  { %2672 = vadd.xlane.f32.xlu1 %v2671_v10  ;;  %2666 = vadd.xlane.f32.xlu0 %v2665_v11 }
0x2e84   :  { %2678 = vadd.xlane.f32.xlu1 %v2677_v12  ;;  %2669 = vadd.xlane.f32.xlu0 %v2668_v13 }
0x2e88   :  { %2675 = vadd.xlane.f32.xlu0 %v2674_v14 }
0x2e8c   :  { %2681 = vadd.xlane.f32.xlu0 %v2680_v9 }
0x2f09   :  { %v2664_v15 = vpop.xlane.xlu1 %2663  ;;  %v2661_v16 = vpop.xlane.xlu0 %2660 }
0x2f0a   :  { %v2685_v17 = vmul.f32 0.25, %v2664_v15  ;;  %v2684_v18 = vmul.f32 0.25, %v2661_v16 }
0x2f0c   :  { %v2693_v19 = vmul.f32 %v2685_v17, %v3965_v59  ;;  %v2692_v20 = vmul.f32 %v2684_v18, %v3971_v62 }
0x2f0d   :  { %v2673_v21 = vpop.xlane.xlu1 %2672  ;;  %v2667_v22 = vpop.xlane.xlu0 %2666 }
0x2f0e   :  { %v2686_v23 = vmul.f32 0.25, %v2667_v22  ;;  %v2701_v24 = vsel %vm430_vm2, %v2693_v19, 0.0  ;;  %v2700_v25 = vsel %vm430_vm2, %v2692_v20, 0.0  ;;  %v2688_v26 = vmul.f32 0.25, %v2673_v21 }
0x2f0f   :  { %v2702_v33 = vadd.f32 %v2701_v24, %v2700_v25 }
0x2f10   :  { %v2694_v27 = vmul.f32 %v2686_v23, %v3967_v60  ;;  %v2696_v59 = vmul.f32 %v2688_v26, %v4005_v52 }
0x2f11   :  { %v2679_v28 = vpop.xlane.xlu1 %2678  ;;  %v2670_v29 = vpop.xlane.xlu0 %2669 }
0x2f12   :  { %v2703_v30 = vsel %vm430_vm2, %v2694_v27, 0.0  ;;  %v2687_v32 = vmul.f32 0.25, %v2670_v29  ;;  %v2690_v34 = vmul.f32 0.25, %v2679_v28  ;;  %v2707_v36 = vsel %vm430_vm2, %v2696_v59, 0.0 }
0x2f13   :  { %v2704_v35 = vadd.f32 %v2703_v30, %v2702_v33 }
0x2f14   :  { %v2695_v62 = vmul.f32 %v2687_v32, %v3963_v58  ;;  %v2698_v60 = vmul.f32 %v2690_v34, %v4009_v53 }
0x2f15   :  { %v2676_v31 = vpop.xlane.xlu0 %2675 }
0x2f16   :  { %v2705_v37 = vsel %vm430_vm2, %v2695_v62, 0.0  ;;  %v2689_v38 = vmul.f32 0.25, %v2676_v31  ;;  %v2711_v58 = vsel %vm430_vm2, %v2698_v60, 0.0 }
0x2f17   :  { %v2706_v39 = vadd.f32 %v2705_v37, %v2704_v35 }
0x2f18   :  { %v2697_v41 = vmul.f32 %v2689_v38, %v4003_v51 }
0x2f19   :  { %v2708_v43 = vadd.f32 %v2707_v36, %v2706_v39  ;;  %v2682_v44 = vpop.xlane.xlu0 %2681 }
0x2f1a   :  { %v2709_v45 = vsel %vm430_vm2, %v2697_v41, 0.0  ;;  %v2691_v52 = vmul.f32 0.25, %v2682_v44 }
0x2f1b   :  { %v2710_v46 = vadd.f32 %v2709_v45, %v2708_v43 }
0x2f1c   :  { %v2699_v47 = vmul.f32 %v2691_v52, %v4011_v4 }
0x2f1d   :  { %v2712_v48 = vadd.f32 %v2711_v58, %v2710_v46 }
0x2f1e   :  { %v2713_v49 = vsel %vm430_vm2, %v2699_v47, 0.0 }
0x2f1f   :  { %v2714_v50 = vadd.f32 %v2713_v49, %v2712_v48 }
0x2f21   :  { %2715 = vst.msk [vmem:[#allocation14] sm:$0x3] %vm430_vm2, %v2714_v50 }
0x2f22   :  { %3525 = shalt.err (!%p3522_p2)
}
0x2f23   :  { %s3526_s2 = scalar_lea.hbm %s4112_s15, 32 }
0x2f24   :  { %p3527_p3 = scmp.ne.s32.totalorder %s4112_s15, %s3526_s2  ;;  %p3530_p4 = scmp.lt.u32.totalorder %s3526_s2, %s4112_s15 }
0x2f26   :  { %p3532_p5 = pnand %p3530_p4, %p3527_p3 }
0x2f28   :  { %3535 = shalt.err (!%p3532_p5)
}
0x2f29   :  { %2725 = dma.vmem_to_hbm [thread:$0]  %s2723_s3, 32, %s4112_s15, [#allocation7]  }
0x2f2a   :  { %3542 = dma.done.wait [#allocation7], 32  }
0x2f2b   :  { %3543 = vsyncadd [#allocation7], 4294967264 }
0x2f2c   :  { %2729 = vsyncpa [#allocation6], 1 }
0x2f2d   :  { %2730 = vsyncpa [#allocation9], 1 }
0x2f2e   :  { %2731 = vsyncpa [#allocation12], 1 }
0x2f2f   :  { %2732 = vsyncpa [#allocation7], 1 }

</bundles_post_ra>
